<compile_context>
chip_gen: v6e
topology: v6e:2x2x1
jax: 0.10.0
libtpu: 0.0.40
codegen_flags: <defaults>
</compile_context>

<pallas_src>
import functools
import math

import jax
import jax.numpy as jnp
from jax.experimental import pallas as pl
from jax.experimental.pallas import tpu as pltpu


def _num_tensorcores() -> int:
    """Best-effort TensorCore count; falls back to 1 (v5e/v6e behavior)."""
    try:
        info = pltpu.get_tpu_info()
        for attr in ("num_cores", "num_tensorcores", "tensorcores_per_chip",
                     "cores_per_chip"):
            v = getattr(info, attr, None)
            if isinstance(v, int) and v > 0:
                return v
    except Exception:
        pass
    try:
        kind = jax.devices()[0].device_kind.lower()
        if "v7" in kind or "7x" in kind:
            return 2
    except Exception:
        pass
    return 1


def _mhsa_kernel(x_ref, w_ref, out_ref, *, num_heads):
    """Fused MHSA on one (Bt, N, Dp) block; every GEMM operand is 128-lane dense.

    x_ref  : (Bt, N, Dp)    bf16 activations, channels zero-padded to Dp
    w_ref  : (Dp, 2*H*Dp)   bf16 merged weights:
               lanes [h*Dp, (h+1)*Dp)        -> A_h  (Wq·Wk merged, 1/sqrt(K) folded)
               lanes [(H+h)*Dp, (H+h+1)*Dp)  -> Bm_h (Wv·Wo merged)
    out_ref: (Bt, N, Dp)
    """
    H = num_heads
    bt, n, dp = x_ref.shape
    rx = x_ref[...].reshape(bt * n, dp)                                # bf16

    # One lane-dense bf16 GEMM produces every per-head operand.
    qaov = jnp.dot(rx, w_ref[...],
                   preferred_element_type=jnp.float32).astype(jnp.bfloat16)

    for bi in range(bt):
        rows = slice(bi * n, (bi + 1) * n)                             # sublane-aligned
        rx_b = rx[rows, :]                                             # (N, Dp)
        out_b = jnp.zeros((n, dp), jnp.float32)
        for h in range(H):
            qa = qaov[rows, h * dp:(h + 1) * dp]                       # (N, Dp) = rx_b @ A_h
            ov = qaov[rows, (H + h) * dp:(H + h + 1) * dp]             # (N, Dp) = rx_b @ Bm_h
            # sim_h = (rx_b A_h) rx_b^T  : one aligned MXU matmul, f32 accumulate.
            sim = jax.lax.dot_general(qa, rx_b, (((1,), (1,)), ((), ())),
                                      preferred_element_type=jnp.float32)   # (N, N)
            # Softmax in f32 (scale already folded into A_h); reciprocal on EUP.
            sim = sim - jnp.max(sim, axis=-1, keepdims=True)
            p = jnp.exp(sim)
            p = p * pl.reciprocal(jnp.sum(p, axis=-1, keepdims=True), approx=True)
            # TODO(synk): dropout_rate > 0 not implemented (reference default 0.0 => identity).
            out_b = out_b + jnp.dot(p.astype(jnp.bfloat16), ov,
                                    preferred_element_type=jnp.float32)      # (N, Dp)
        out_ref[bi, :, :] = out_b.astype(out_ref.dtype)


def multi_head_attention(x, wq, wk, wv, wo):
    """x: (B, *spatial, C) channels-last.
    wq, wk: (H, K, C);  wv: (H, V, C);  wo: (C, H, V).  Returns (B, N, C)."""
    num_heads, key_dim, d = wq.shape
    assert num_heads == key_dim, "reference einsum requires num_heads == key_dim"
    assert x.shape[-1] == d

    b = x.shape[0]
    n = 1
    for s in x.shape[1:-1]:
        n *= s
    rx = x.reshape(b, n, d)

    dp = max(128, ((d + 127) // 128) * 128)          # lane-dense channel dim
    inv_sqrt_k = 1.0 / math.sqrt(key_dim)

    # --- merged weights (exact linearity identities, built once in plain JAX) ---
    #   sim[b,n,h,m]  = rx[b,n,:] @ A_h @ rx[b,m,:]^T,  A_h[d,e]  = sum_c wq[c,h,d] wk[h,c,e]
    #   out[b,n,:]    = sum_h scores_h @ (rx_b @ Bm_h), Bm_h[e,d] = sum_v wv[h,v,e] wo[d,h,v]
    A = jnp.einsum('chd,hce->hde', wq, wk) * inv_sqrt_k                 # (H, D, D)
    Bm = jnp.einsum('hve,dhv->hed', wv, wo)                             # (H, D, D)
    A_p = jnp.zeros((num_heads, dp, dp), jnp.float32).at[:, :d, :d].set(A)
    B_p = jnp.zeros((num_heads, dp, dp), jnp.float32).at[:, :d, :d].set(Bm)
    a_cols = jnp.transpose(A_p, (1, 0, 2)).reshape(dp, num_heads * dp)
    b_cols = jnp.transpose(B_p, (1, 0, 2)).reshape(dp, num_heads * dp)
    w_fused = jnp.concatenate([a_cols, b_cols], axis=1).astype(jnp.bfloat16)  # (Dp, 2H*Dp)

    # Lane-dense bf16 activations: pad channels once, outside the kernel.
    x_p = jnp.zeros((b, n, dp), jnp.bfloat16).at[:, :, :d].set(rx.astype(jnp.bfloat16))

    # Grid: single block on 1-TC chips; 2-way "parallel" only with >=2 TensorCores.
    if _num_tensorcores() >= 2 and b % 2 == 0 and b >= 2:
        bt, grid = b // 2, (2,)
    else:
        bt, grid = b, (1,)

    kernel = functools.partial(_mhsa_kernel, num_heads=num_heads)
    out_p = pl.pallas_call(
        kernel,
        out_shape=jax.ShapeDtypeStruct((b, n, dp), x.dtype),
        grid_spec=pltpu.PrefetchScalarGridSpec(
            num_scalar_prefetch=0,
            grid=grid,
            in_specs=[
                pl.BlockSpec((bt, n, dp), lambda i: (i, 0, 0)),
                pl.BlockSpec(w_fused.shape, lambda i: (0, 0)),
            ],
            out_specs=pl.BlockSpec((bt, n, dp), lambda i: (i, 0, 0)),
        ),
        compiler_params=pltpu.CompilerParams(
            dimension_semantics=("parallel",),
            vmem_limit_bytes=32 * 1024 * 1024),
    )(x_p, w_fused)
    return out_p[:, :, :d]


if __name__ == "__main__":
    B, HS, WS = 2, 8, 8
    C = 16              # input_channels
    NUM_HEADS = 4
    KEY_DIM = 4         # must equal num_heads (see note at top)
    VALUE_DIM = 8

    key = jax.random.PRNGKey(0)
    kx, kq, kk, kv, ko = jax.random.split(key, 5)
    scale = 1.0 / math.sqrt(C)
    x = jax.random.normal(kx, (B, HS, WS, C), jnp.float32)
    wq = jax.random.normal(kq, (NUM_HEADS, KEY_DIM, C), jnp.float32) * scale
    wk = jax.random.normal(kk, (NUM_HEADS, KEY_DIM, C), jnp.float32) * scale
    wv = jax.random.normal(kv, (NUM_HEADS, VALUE_DIM, C), jnp.float32) * scale
    wo = jax.random.normal(ko, (C, NUM_HEADS, VALUE_DIM), jnp.float32) * scale

    out = multi_head_attention(x, wq, wk, wv, wo)
    out = jax.block_until_ready(out)

    # Pure-JAX f32 reference mirroring the PyTorch einsums exactly.
    rx = x.reshape(B, HS * WS, C)
    q = jnp.einsum('bnd,hkd->bnhk', rx, wq)
    k = jnp.einsum('bnd,hkd->bnhk', rx, wk)
    v = jnp.einsum('bnd,hvd->bnhv', rx, wv)
    sim = jnp.einsum('bnkh,bmhk->bnhm', q, k)
    scores = jax.nn.softmax(sim / math.sqrt(KEY_DIM), axis=-1)
    o = jnp.einsum('bnhm,bmhv->bnhv', scores, v)
    ref = jnp.einsum('bnhv,dhv->bnd', o, wo)

    assert out.shape == (B, HS * WS, C)
    err = float(jnp.max(jnp.abs(out - ref)))
    assert jnp.allclose(out, ref, atol=5e-2, rtol=5e-2), err
    print("KERNEL_OK")
</pallas_src>

<mosaic_0001>
module attributes {stable_mosaic.version = 11 : i64} {
  func.func @_mhsa_kernel(%arg0: i32, %arg1: memref<2x64x128xbf16, #tpu.memory_space<vmem>>, %arg2: memref<128x1024xbf16, #tpu.memory_space<vmem>>, %arg3: memref<2x64x128xf32, #tpu.memory_space<vmem>>) attributes {dimension_semantics = [#tpu.dimension_semantics<parallel>], iteration_bounds = array<i64: 1>, scalar_prefetch = 0 : i64, scratch_operands = 0 : i64, tpu.core_type = #tpu.core_type<tc>, window_params = [{transform_indices = @transform_0, window_bounds = array<i64: 2, 64, 128>}, {pipeline_mode = #tpu.pipeline_mode<synchronous>, transform_indices = @transform_1, window_bounds = array<i64: 128, 1024>}, {transform_indices = @transform_2, window_bounds = array<i64: 2, 64, 128>}]} {
    %c0 = arith.constant 0 : index
    %c0_0 = arith.constant 0 : index
    %c0_1 = arith.constant 0 : index
    %0 = vector.load %arg1[%c0, %c0_0, %c0_1] : memref<2x64x128xbf16, #tpu.memory_space<vmem>>, vector<2x64x128xbf16>
    %1 = vector.shape_cast %0 : vector<2x64x128xbf16> to vector<128x128xbf16>
    %c0_2 = arith.constant 0 : index
    %c0_3 = arith.constant 0 : index
    %2 = vector.load %arg2[%c0_2, %c0_3] : memref<128x1024xbf16, #tpu.memory_space<vmem>>, vector<128x1024xbf16>
    %cst = arith.constant dense<0.000000e+00> : vector<128x1024xf32>
    %3 = tpu.matmul %1, %2, %cst {dimension_numbers = #tpu.dot_dimension_numbers<[1], [0], [0], [1], [0, 0, 1, 1], [], []>} : vector<128x128xbf16>, vector<128x1024xbf16>, vector<128x1024xf32> -> vector<128x1024xf32>
    %4 = arith.truncf %3 : vector<128x1024xf32> to vector<128x1024xbf16>
    %5 = vector.extract_strided_slice %1 {offsets = [0, 0], sizes = [64, 128], strides = [1, 1]} : vector<128x128xbf16> to vector<64x128xbf16>
    %cst_4 = arith.constant 0.000000e+00 : f32
    %6 = vector.broadcast %cst_4 : f32 to vector<64x128xf32>
    %7 = vector.extract_strided_slice %4 {offsets = [0, 0], sizes = [64, 128], strides = [1, 1]} : vector<128x1024xbf16> to vector<64x128xbf16>
    %8 = vector.extract_strided_slice %4 {offsets = [0, 512], sizes = [64, 128], strides = [1, 1]} : vector<128x1024xbf16> to vector<64x128xbf16>
    %cst_5 = arith.constant dense<0.000000e+00> : vector<64x64xf32>
    %9 = tpu.matmul %7, %5, %cst_5 {dimension_numbers = #tpu.dot_dimension_numbers<[1], [1], [0], [0], [0, 0, 1, 0], [], []>} : vector<64x128xbf16>, vector<64x128xbf16>, vector<64x64xf32> -> vector<64x64xf32>
    %cst_6 = arith.constant dense<0xFF800000> : vector<64xf32>
    %10 = vector.multi_reduction <maximumf>, %9, %cst_6 [1] : vector<64x64xf32> to vector<64xf32>
    %11 = vector.shape_cast %10 : vector<64xf32> to vector<64x1xf32>
    %12 = vector.broadcast %11 : vector<64x1xf32> to vector<64x64xf32>
    %13 = arith.subf %9, %12 : vector<64x64xf32>
    %14 = math.exp %13 : vector<64x64xf32>
    %cst_7 = arith.constant dense<0.000000e+00> : vector<64xf32>
    %15 = vector.multi_reduction <add>, %14, %cst_7 [1] : vector<64x64xf32> to vector<64xf32>
    %16 = vector.shape_cast %15 : vector<64xf32> to vector<64x1xf32>
    %17 = tpu.reciprocal %16 {approx = true} : vector<64x1xf32> -> vector<64x1xf32>
    %18 = vector.broadcast %17 : vector<64x1xf32> to vector<64x64xf32>
    %19 = arith.mulf %14, %18 : vector<64x64xf32>
    %20 = arith.truncf %19 : vector<64x64xf32> to vector<64x64xbf16>
    %cst_8 = arith.constant dense<0.000000e+00> : vector<64x128xf32>
    %21 = tpu.matmul %20, %8, %cst_8 {dimension_numbers = #tpu.dot_dimension_numbers<[1], [0], [0], [1], [0, 0, 1, 1], [], []>} : vector<64x64xbf16>, vector<64x128xbf16>, vector<64x128xf32> -> vector<64x128xf32>
    %22 = arith.addf %6, %21 : vector<64x128xf32>
    %23 = vector.extract_strided_slice %4 {offsets = [0, 128], sizes = [64, 128], strides = [1, 1]} : vector<128x1024xbf16> to vector<64x128xbf16>
    %24 = vector.extract_strided_slice %4 {offsets = [0, 640], sizes = [64, 128], strides = [1, 1]} : vector<128x1024xbf16> to vector<64x128xbf16>
    %cst_9 = arith.constant dense<0.000000e+00> : vector<64x64xf32>
    %25 = tpu.matmul %23, %5, %cst_9 {dimension_numbers = #tpu.dot_dimension_numbers<[1], [1], [0], [0], [0, 0, 1, 0], [], []>} : vector<64x128xbf16>, vector<64x128xbf16>, vector<64x64xf32> -> vector<64x64xf32>
    %cst_10 = arith.constant dense<0xFF800000> : vector<64xf32>
    %26 = vector.multi_reduction <maximumf>, %25, %cst_10 [1] : vector<64x64xf32> to vector<64xf32>
    %27 = vector.shape_cast %26 : vector<64xf32> to vector<64x1xf32>
    %28 = vector.broadcast %27 : vector<64x1xf32> to vector<64x64xf32>
    %29 = arith.subf %25, %28 : vector<64x64xf32>
    %30 = math.exp %29 : vector<64x64xf32>
    %cst_11 = arith.constant dense<0.000000e+00> : vector<64xf32>
    %31 = vector.multi_reduction <add>, %30, %cst_11 [1] : vector<64x64xf32> to vector<64xf32>
    %32 = vector.shape_cast %31 : vector<64xf32> to vector<64x1xf32>
    %33 = tpu.reciprocal %32 {approx = true} : vector<64x1xf32> -> vector<64x1xf32>
    %34 = vector.broadcast %33 : vector<64x1xf32> to vector<64x64xf32>
    %35 = arith.mulf %30, %34 : vector<64x64xf32>
    %36 = arith.truncf %35 : vector<64x64xf32> to vector<64x64xbf16>
    %cst_12 = arith.constant dense<0.000000e+00> : vector<64x128xf32>
    %37 = tpu.matmul %36, %24, %cst_12 {dimension_numbers = #tpu.dot_dimension_numbers<[1], [0], [0], [1], [0, 0, 1, 1], [], []>} : vector<64x64xbf16>, vector<64x128xbf16>, vector<64x128xf32> -> vector<64x128xf32>
    %38 = arith.addf %22, %37 : vector<64x128xf32>
    %39 = vector.extract_strided_slice %4 {offsets = [0, 256], sizes = [64, 128], strides = [1, 1]} : vector<128x1024xbf16> to vector<64x128xbf16>
    %40 = vector.extract_strided_slice %4 {offsets = [0, 768], sizes = [64, 128], strides = [1, 1]} : vector<128x1024xbf16> to vector<64x128xbf16>
    %cst_13 = arith.constant dense<0.000000e+00> : vector<64x64xf32>
    %41 = tpu.matmul %39, %5, %cst_13 {dimension_numbers = #tpu.dot_dimension_numbers<[1], [1], [0], [0], [0, 0, 1, 0], [], []>} : vector<64x128xbf16>, vector<64x128xbf16>, vector<64x64xf32> -> vector<64x64xf32>
    %cst_14 = arith.constant dense<0xFF800000> : vector<64xf32>
    %42 = vector.multi_reduction <maximumf>, %41, %cst_14 [1] : vector<64x64xf32> to vector<64xf32>
    %43 = vector.shape_cast %42 : vector<64xf32> to vector<64x1xf32>
    %44 = vector.broadcast %43 : vector<64x1xf32> to vector<64x64xf32>
    %45 = arith.subf %41, %44 : vector<64x64xf32>
    %46 = math.exp %45 : vector<64x64xf32>
    %cst_15 = arith.constant dense<0.000000e+00> : vector<64xf32>
    %47 = vector.multi_reduction <add>, %46, %cst_15 [1] : vector<64x64xf32> to vector<64xf32>
    %48 = vector.shape_cast %47 : vector<64xf32> to vector<64x1xf32>
    %49 = tpu.reciprocal %48 {approx = true} : vector<64x1xf32> -> vector<64x1xf32>
    %50 = vector.broadcast %49 : vector<64x1xf32> to vector<64x64xf32>
    %51 = arith.mulf %46, %50 : vector<64x64xf32>
    %52 = arith.truncf %51 : vector<64x64xf32> to vector<64x64xbf16>
    %cst_16 = arith.constant dense<0.000000e+00> : vector<64x128xf32>
    %53 = tpu.matmul %52, %40, %cst_16 {dimension_numbers = #tpu.dot_dimension_numbers<[1], [0], [0], [1], [0, 0, 1, 1], [], []>} : vector<64x64xbf16>, vector<64x128xbf16>, vector<64x128xf32> -> vector<64x128xf32>
    %54 = arith.addf %38, %53 : vector<64x128xf32>
    %55 = vector.extract_strided_slice %4 {offsets = [0, 384], sizes = [64, 128], strides = [1, 1]} : vector<128x1024xbf16> to vector<64x128xbf16>
    %56 = vector.extract_strided_slice %4 {offsets = [0, 896], sizes = [64, 128], strides = [1, 1]} : vector<128x1024xbf16> to vector<64x128xbf16>
    %cst_17 = arith.constant dense<0.000000e+00> : vector<64x64xf32>
    %57 = tpu.matmul %55, %5, %cst_17 {dimension_numbers = #tpu.dot_dimension_numbers<[1], [1], [0], [0], [0, 0, 1, 0], [], []>} : vector<64x128xbf16>, vector<64x128xbf16>, vector<64x64xf32> -> vector<64x64xf32>
    %cst_18 = arith.constant dense<0xFF800000> : vector<64xf32>
    %58 = vector.multi_reduction <maximumf>, %57, %cst_18 [1] : vector<64x64xf32> to vector<64xf32>
    %59 = vector.shape_cast %58 : vector<64xf32> to vector<64x1xf32>
    %60 = vector.broadcast %59 : vector<64x1xf32> to vector<64x64xf32>
    %61 = arith.subf %57, %60 : vector<64x64xf32>
    %62 = math.exp %61 : vector<64x64xf32>
    %cst_19 = arith.constant dense<0.000000e+00> : vector<64xf32>
    %63 = vector.multi_reduction <add>, %62, %cst_19 [1] : vector<64x64xf32> to vector<64xf32>
    %64 = vector.shape_cast %63 : vector<64xf32> to vector<64x1xf32>
    %65 = tpu.reciprocal %64 {approx = true} : vector<64x1xf32> -> vector<64x1xf32>
    %66 = vector.broadcast %65 : vector<64x1xf32> to vector<64x64xf32>
    %67 = arith.mulf %62, %66 : vector<64x64xf32>
    %68 = arith.truncf %67 : vector<64x64xf32> to vector<64x64xbf16>
    %cst_20 = arith.constant dense<0.000000e+00> : vector<64x128xf32>
    %69 = tpu.matmul %68, %56, %cst_20 {dimension_numbers = #tpu.dot_dimension_numbers<[1], [0], [0], [1], [0, 0, 1, 1], [], []>} : vector<64x64xbf16>, vector<64x128xbf16>, vector<64x128xf32> -> vector<64x128xf32>
    %70 = arith.addf %54, %69 : vector<64x128xf32>
    %c0_21 = arith.constant 0 : index
    %c0_22 = arith.constant 0 : index
    %c0_23 = arith.constant 0 : index
    %71 = vector.load %arg3[%c0_21, %c0_22, %c0_23] : memref<2x64x128xf32, #tpu.memory_space<vmem>>, vector<1x64x128xf32>
    %72 = vector.shape_cast %71 : vector<1x64x128xf32> to vector<64x128xf32>
    %73 = vector.shape_cast %70 : vector<64x128xf32> to vector<1x64x128xf32>
    tpu.vector_store %arg3[%c0_21, %c0_22, %c0_23], %73 {strides = array<i32>} : memref<2x64x128xf32, #tpu.memory_space<vmem>>, vector<1x64x128xf32>,
    %74 = vector.extract_strided_slice %1 {offsets = [64, 0], sizes = [64, 128], strides = [1, 1]} : vector<128x128xbf16> to vector<64x128xbf16>
    %cst_24 = arith.constant 0.000000e+00 : f32
    %75 = vector.broadcast %cst_24 : f32 to vector<64x128xf32>
    %76 = vector.extract_strided_slice %4 {offsets = [64, 0], sizes = [64, 128], strides = [1, 1]} : vector<128x1024xbf16> to vector<64x128xbf16>
    %77 = vector.extract_strided_slice %4 {offsets = [64, 512], sizes = [64, 128], strides = [1, 1]} : vector<128x1024xbf16> to vector<64x128xbf16>
    %cst_25 = arith.constant dense<0.000000e+00> : vector<64x64xf32>
    %78 = tpu.matmul %76, %74, %cst_25 {dimension_numbers = #tpu.dot_dimension_numbers<[1], [1], [0], [0], [0, 0, 1, 0], [], []>} : vector<64x128xbf16>, vector<64x128xbf16>, vector<64x64xf32> -> vector<64x64xf32>
    %cst_26 = arith.constant dense<0xFF800000> : vector<64xf32>
    %79 = vector.multi_reduction <maximumf>, %78, %cst_26 [1] : vector<64x64xf32> to vector<64xf32>
    %80 = vector.shape_cast %79 : vector<64xf32> to vector<64x1xf32>
    %81 = vector.broadcast %80 : vector<64x1xf32> to vector<64x64xf32>
    %82 = arith.subf %78, %81 : vector<64x64xf32>
    %83 = math.exp %82 : vector<64x64xf32>
    %cst_27 = arith.constant dense<0.000000e+00> : vector<64xf32>
    %84 = vector.multi_reduction <add>, %83, %cst_27 [1] : vector<64x64xf32> to vector<64xf32>
    %85 = vector.shape_cast %84 : vector<64xf32> to vector<64x1xf32>
    %86 = tpu.reciprocal %85 {approx = true} : vector<64x1xf32> -> vector<64x1xf32>
    %87 = vector.broadcast %86 : vector<64x1xf32> to vector<64x64xf32>
    %88 = arith.mulf %83, %87 : vector<64x64xf32>
    %89 = arith.truncf %88 : vector<64x64xf32> to vector<64x64xbf16>
    %cst_28 = arith.constant dense<0.000000e+00> : vector<64x128xf32>
    %90 = tpu.matmul %89, %77, %cst_28 {dimension_numbers = #tpu.dot_dimension_numbers<[1], [0], [0], [1], [0, 0, 1, 1], [], []>} : vector<64x64xbf16>, vector<64x128xbf16>, vector<64x128xf32> -> vector<64x128xf32>
    %91 = arith.addf %75, %90 : vector<64x128xf32>
    %92 = vector.extract_strided_slice %4 {offsets = [64, 128], sizes = [64, 128], strides = [1, 1]} : vector<128x1024xbf16> to vector<64x128xbf16>
    %93 = vector.extract_strided_slice %4 {offsets = [64, 640], sizes = [64, 128], strides = [1, 1]} : vector<128x1024xbf16> to vector<64x128xbf16>
    %cst_29 = arith.constant dense<0.000000e+00> : vector<64x64xf32>
    %94 = tpu.matmul %92, %74, %cst_29 {dimension_numbers = #tpu.dot_dimension_numbers<[1], [1], [0], [0], [0, 0, 1, 0], [], []>} : vector<64x128xbf16>, vector<64x128xbf16>, vector<64x64xf32> -> vector<64x64xf32>
    %cst_30 = arith.constant dense<0xFF800000> : vector<64xf32>
    %95 = vector.multi_reduction <maximumf>, %94, %cst_30 [1] : vector<64x64xf32> to vector<64xf32>
    %96 = vector.shape_cast %95 : vector<64xf32> to vector<64x1xf32>
    %97 = vector.broadcast %96 : vector<64x1xf32> to vector<64x64xf32>
    %98 = arith.subf %94, %97 : vector<64x64xf32>
    %99 = math.exp %98 : vector<64x64xf32>
    %cst_31 = arith.constant dense<0.000000e+00> : vector<64xf32>
    %100 = vector.multi_reduction <add>, %99, %cst_31 [1] : vector<64x64xf32> to vector<64xf32>
    %101 = vector.shape_cast %100 : vector<64xf32> to vector<64x1xf32>
    %102 = tpu.reciprocal %101 {approx = true} : vector<64x1xf32> -> vector<64x1xf32>
    %103 = vector.broadcast %102 : vector<64x1xf32> to vector<64x64xf32>
    %104 = arith.mulf %99, %103 : vector<64x64xf32>
    %105 = arith.truncf %104 : vector<64x64xf32> to vector<64x64xbf16>
    %cst_32 = arith.constant dense<0.000000e+00> : vector<64x128xf32>
    %106 = tpu.matmul %105, %93, %cst_32 {dimension_numbers = #tpu.dot_dimension_numbers<[1], [0], [0], [1], [0, 0, 1, 1], [], []>} : vector<64x64xbf16>, vector<64x128xbf16>, vector<64x128xf32> -> vector<64x128xf32>
    %107 = arith.addf %91, %106 : vector<64x128xf32>
    %108 = vector.extract_strided_slice %4 {offsets = [64, 256], sizes = [64, 128], strides = [1, 1]} : vector<128x1024xbf16> to vector<64x128xbf16>
    %109 = vector.extract_strided_slice %4 {offsets = [64, 768], sizes = [64, 128], strides = [1, 1]} : vector<128x1024xbf16> to vector<64x128xbf16>
    %cst_33 = arith.constant dense<0.000000e+00> : vector<64x64xf32>
    %110 = tpu.matmul %108, %74, %cst_33 {dimension_numbers = #tpu.dot_dimension_numbers<[1], [1], [0], [0], [0, 0, 1, 0], [], []>} : vector<64x128xbf16>, vector<64x128xbf16>, vector<64x64xf32> -> vector<64x64xf32>
    %cst_34 = arith.constant dense<0xFF800000> : vector<64xf32>
    %111 = vector.multi_reduction <maximumf>, %110, %cst_34 [1] : vector<64x64xf32> to vector<64xf32>
    %112 = vector.shape_cast %111 : vector<64xf32> to vector<64x1xf32>
    %113 = vector.broadcast %112 : vector<64x1xf32> to vector<64x64xf32>
    %114 = arith.subf %110, %113 : vector<64x64xf32>
    %115 = math.exp %114 : vector<64x64xf32>
    %cst_35 = arith.constant dense<0.000000e+00> : vector<64xf32>
    %116 = vector.multi_reduction <add>, %115, %cst_35 [1] : vector<64x64xf32> to vector<64xf32>
    %117 = vector.shape_cast %116 : vector<64xf32> to vector<64x1xf32>
    %118 = tpu.reciprocal %117 {approx = true} : vector<64x1xf32> -> vector<64x1xf32>
    %119 = vector.broadcast %118 : vector<64x1xf32> to vector<64x64xf32>
    %120 = arith.mulf %115, %119 : vector<64x64xf32>
    %121 = arith.truncf %120 : vector<64x64xf32> to vector<64x64xbf16>
    %cst_36 = arith.constant dense<0.000000e+00> : vector<64x128xf32>
    %122 = tpu.matmul %121, %109, %cst_36 {dimension_numbers = #tpu.dot_dimension_numbers<[1], [0], [0], [1], [0, 0, 1, 1], [], []>} : vector<64x64xbf16>, vector<64x128xbf16>, vector<64x128xf32> -> vector<64x128xf32>
    %123 = arith.addf %107, %122 : vector<64x128xf32>
    %124 = vector.extract_strided_slice %4 {offsets = [64, 384], sizes = [64, 128], strides = [1, 1]} : vector<128x1024xbf16> to vector<64x128xbf16>
    %125 = vector.extract_strided_slice %4 {offsets = [64, 896], sizes = [64, 128], strides = [1, 1]} : vector<128x1024xbf16> to vector<64x128xbf16>
    %cst_37 = arith.constant dense<0.000000e+00> : vector<64x64xf32>
    %126 = tpu.matmul %124, %74, %cst_37 {dimension_numbers = #tpu.dot_dimension_numbers<[1], [1], [0], [0], [0, 0, 1, 0], [], []>} : vector<64x128xbf16>, vector<64x128xbf16>, vector<64x64xf32> -> vector<64x64xf32>
    %cst_38 = arith.constant dense<0xFF800000> : vector<64xf32>
    %127 = vector.multi_reduction <maximumf>, %126, %cst_38 [1] : vector<64x64xf32> to vector<64xf32>
    %128 = vector.shape_cast %127 : vector<64xf32> to vector<64x1xf32>
    %129 = vector.broadcast %128 : vector<64x1xf32> to vector<64x64xf32>
    %130 = arith.subf %126, %129 : vector<64x64xf32>
    %131 = math.exp %130 : vector<64x64xf32>
    %cst_39 = arith.constant dense<0.000000e+00> : vector<64xf32>
    %132 = vector.multi_reduction <add>, %131, %cst_39 [1] : vector<64x64xf32> to vector<64xf32>
    %133 = vector.shape_cast %132 : vector<64xf32> to vector<64x1xf32>
    %134 = tpu.reciprocal %133 {approx = true} : vector<64x1xf32> -> vector<64x1xf32>
    %135 = vector.broadcast %134 : vector<64x1xf32> to vector<64x64xf32>
    %136 = arith.mulf %131, %135 : vector<64x64xf32>
    %137 = arith.truncf %136 : vector<64x64xf32> to vector<64x64xbf16>
    %cst_40 = arith.constant dense<0.000000e+00> : vector<64x128xf32>
    %138 = tpu.matmul %137, %125, %cst_40 {dimension_numbers = #tpu.dot_dimension_numbers<[1], [0], [0], [1], [0, 0, 1, 1], [], []>} : vector<64x64xbf16>, vector<64x128xbf16>, vector<64x128xf32> -> vector<64x128xf32>
    %139 = arith.addf %123, %138 : vector<64x128xf32>
    %c1 = arith.constant 1 : index
    %c0_41 = arith.constant 0 : index
    %c0_42 = arith.constant 0 : index
    %140 = vector.load %arg3[%c1, %c0_41, %c0_42] : memref<2x64x128xf32, #tpu.memory_space<vmem>>, vector<1x64x128xf32>
    %141 = vector.shape_cast %140 : vector<1x64x128xf32> to vector<64x128xf32>
    %142 = vector.shape_cast %139 : vector<64x128xf32> to vector<1x64x128xf32>
    tpu.vector_store %arg3[%c1, %c0_41, %c0_42], %142 {strides = array<i32>} : memref<2x64x128xf32, #tpu.memory_space<vmem>>, vector<1x64x128xf32>,
    return
  }
  func.func @transform_0(%arg0: i32) -> (i32, i32, i32) {
    %c0_i32 = arith.constant 0 : i32
    %c0_i32_0 = arith.constant 0 : i32
    %c0_i32_1 = arith.constant 0 : i32
    return %arg0, %c0_i32, %c0_i32_0 : i32, i32, i32
  }
  func.func @transform_1(%arg0: i32) -> (i32, i32) {
    %c0_i32 = arith.constant 0 : i32
    %c0_i32_0 = arith.constant 0 : i32
    %c0_i32_1 = arith.constant 0 : i32
    return %c0_i32, %c0_i32_0 : i32, i32
  }
  func.func @transform_2(%arg0: i32) -> (i32, i32, i32) {
    %c0_i32 = arith.constant 0 : i32
    %c0_i32_0 = arith.constant 0 : i32
    %c0_i32_1 = arith.constant 0 : i32
    return %arg0, %c0_i32, %c0_i32_0 : i32, i32, i32
  }
}

</mosaic_0001>

<bundles_post_ra>
// kernel: tpu_custom_call.1
= control target key start
LH: loop header
LB: loop body
LE: loop exit
PB: predicated region body
PF: predicated region fallthrough
CT: control target
= control target key end

     0   :  { %7 = vsyncpa [#allocation3], 0  ;;  %s4882_s0 = inlined_call_operand.hbm [shape: bf16[2,64,128], index: 0, kind: input, shape index: {}]   ;;  %s4883_s1 = inlined_call_operand.hbm [shape: bf16[128,1024], index: 1, kind: input, shape index: {}]   ;;  %s4884_s2 = inlined_call_operand.hbm [shape: f32[2,64,128], index: 2, kind: output, shape index: {}]  }
   0x1   :  { %8 = vsyncpa [#allocation6], 0 }
   0x2   :  { %9 = vsyncpa [#allocation4], 0  ;;  %s3785_s9 = smov [#allocation2]  }
   0x3   :  { %s15_s10 = sshll.u32 %s3785_s9, 4  ;;  %s16_s10 = int_to_ptr.vmem [resolvable:$true] %s15_s10 }
   0x4   :  { %s3727_s11 = scalar_lea.vmem %s16_s10, 1024  ;;  %p3732_p1 = scmp.lt.s32.totalorder %s16_s10, %s16_s10 }
   0x5   :  { %p3728_p0 = scmp.ne.s32.totalorder %s16_s10, %s3727_s11  ;;  %p3733_p2 = scmp.lt.s32.totalorder %s3727_s11, %s3727_s11 }
   0x7   :  { %p3734_p3 = por %p3733_p2, %p3732_p1 }
   0x9   :  { %p3735_p4 = pnand %p3734_p3, %p3728_p0 }
   0xb   :  { %3738 = shalt.err (!%p3735_p4)
}
   0xc   :  { %s3786_s12 = smov 64   ;;  %s3787_s13 = smov 4  }
   0xd   :  { %21 = dma.hbm_to_vmem [thread:$0]  %s4882_s0, 1024, %s16_s10, [#allocation3], %s3786_s12, %s3786_s12, %s3787_s13  }
   0xe   :  { %s3788_s16 = smov [#allocation5]  }
   0xf   :  { %s27_s17 = sshll.u32 %s3788_s16, 4  ;;  %s28_s17 = int_to_ptr.vmem [resolvable:$true] %s27_s17 }
  0x10   :  { %s3747_s18 = scalar_lea.vmem %s28_s17, 8192  ;;  %p3752_p6 = scmp.lt.s32.totalorder %s28_s17, %s28_s17 }
  0x11   :  { %p3748_p5 = scmp.ne.s32.totalorder %s28_s17, %s3747_s18  ;;  %p3753_p7 = scmp.lt.s32.totalorder %s3747_s18, %s3747_s18 }
  0x13   :  { %p3754_p8 = por %p3753_p7, %p3752_p6 }
  0x15   :  { %p3755_p9 = pnand %p3754_p8, %p3748_p5 }
  0x17   :  { %3758 = shalt.err (!%p3755_p9)
}
  0x18   :  { %s3789_s19 = smov 512   ;;  %s3790_s20 = smov 32  }
  0x19   :  { %33 = dma.hbm_to_vmem [thread:$0]  %s4883_s1, 8192, %s28_s17, [#allocation6], %s3789_s19, %s3789_s19, %s3790_s20  }
  0x1a   :  { %3779 = dma.done.wait [#allocation3], 1024  }
  0x1b   :  { %3780 = vsyncadd [#allocation3], 4294966272 }
  0x1c   :  { %3781 = dma.done.wait [#allocation6], 8192  }
  0x1d   :  { %3782 = vsyncadd [#allocation6], 4294959104  ;;  %v3791_v0 = vmov 0   ;;  %v113_v1 = vld [vmem:[#allocation5 + $0x1c0] sm:$0xff]  ;;  %v114_v17 = vld [vmem:[#allocation5 + $0x1c8] sm:$0xff]  ;;  %vm1070_vm0 = vcmask 523264  }
  0x1e   :  { %521 = vmatprep.mubr.bf16.mxu0 %v3791_v0  ;;  %634 = vmatprep.mubr.bf16.mxu1 %v3791_v0  ;;  %v117_v2 = vld [vmem:[#allocation5 + $0x1e0] sm:$0xff]  ;;  %v118_v18 = vld [vmem:[#allocation5 + $0x1e8] sm:$0xff]  ;;  %v115_v55 = vld [vmem:[#allocation5 + $0x1d0] sm:$0xff]  ;;  %s3792_s0 = smov [#allocation7]  }
  0x1f   :  { %v105_v3 = vld [vmem:[#allocation5 + $0x180] sm:$0xff]  ;;  %v3010_v4 = vcombine.high %v113_v1, %v117_v2  ;;  %v3009_v5 = vcombine.low %v113_v1, %v117_v2  ;;  %v3012_v20 = vcombine.high %v114_v17, %v118_v18  ;;  %v3011_v21 = vcombine.low %v114_v17, %v118_v18  ;;  %v106_v22 = vld [vmem:[#allocation5 + $0x188] sm:$0xff]  ;;  %v119_v56 = vld [vmem:[#allocation5 + $0x1f0] sm:$0xff]  ;;  %s2932_s1 = sshll.u32 %s3792_s0, 4  ;;  %s2933_s1 = int_to_ptr.vmem [resolvable:$true] %s2932_s1 }
  0x20   :  { %v109_v6 = vld [vmem:[#allocation5 + $0x1a0] sm:$0xff]  ;;  %v110_v23 = vld [vmem:[#allocation5 + $0x1a8] sm:$0xff]  ;;  %v3014_v61 = vcombine.high %v115_v55, %v119_v56  ;;  %v107_v63 = vld [vmem:[#allocation5 + $0x190] sm:$0xff]  ;;  %s3759_s23 = scalar_lea.vmem %s2933_s1, 2048  ;;  %p3764_p11 = scmp.lt.s32.totalorder %s2933_s1, %s2933_s1 }
  0x21   :  { %v3002_v7 = vcombine.high %v105_v3, %v109_v6  ;;  %v97_v8 = vld [vmem:[#allocation5 + $0x140] sm:$0xff]  ;;  %489 = vmatprep.subr.bf16.mxu0 %v3010_v4  ;;  %v3001_v10 = vcombine.low %v105_v3, %v109_v6  ;;  %v3004_v24 = vcombine.high %v106_v22, %v110_v23  ;;  %v98_v25 = vld [vmem:[#allocation5 + $0x148] sm:$0xff]  ;;  %602 = vmatprep.subr.bf16.mxu1 %v3012_v20  ;;  %v111_v1 = vld [vmem:[#allocation5 + $0x1b0] sm:$0xff]  ;;  %p3760_p10 = scmp.ne.s32.totalorder %s2933_s1, %s3759_s23  ;;  %p3765_p12 = scmp.lt.s32.totalorder %s3759_s23, %s3759_s23 }
  0x22   :  { %v101_v9 = vld [vmem:[#allocation5 + $0x160] sm:$0xff]  ;;  %490 = vmatpush1.bf16.msra.mxu0 %v3009_v5  ;;  %v102_v26 = vld [vmem:[#allocation5 + $0x168] sm:$0xff]  ;;  %603 = vmatpush1.bf16.msra.mxu1 %v3011_v21  ;;  %v3003_v29 = vcombine.low %v106_v22, %v110_v23  ;;  %v3013_v5 = vcombine.low %v115_v55, %v119_v56  ;;  %v108_v18 = vld [vmem:[#allocation5 + $0x198] sm:$0xff] }
  0x23   :  { %491 = vmatprep.subr.bf16.mxu0 %v3002_v7  ;;  %v2994_v11 = vcombine.high %v97_v8, %v101_v9  ;;  %v89_v12 = vld [vmem:[#allocation5 + $0x100] sm:$0xff]  ;;  %v2993_v14 = vcombine.low %v97_v8, %v101_v9  ;;  %604 = vmatprep.subr.bf16.mxu1 %v3004_v24  ;;  %v2996_v32 = vcombine.high %v98_v25, %v102_v26  ;;  %v90_v33 = vld [vmem:[#allocation5 + $0x108] sm:$0xff]  ;;  %v99_v9 = vld [vmem:[#allocation5 + $0x150] sm:$0xff]  ;;  %p3766_p13 = por %p3765_p12, %p3764_p11 }
  0x24   :  { %v93_v13 = vld [vmem:[#allocation5 + $0x120] sm:$0xff]  ;;  %v94_v34 = vld [vmem:[#allocation5 + $0x128] sm:$0xff]  ;;  %v2995_v37 = vcombine.low %v98_v25, %v102_v26  ;;  %v3006_v7 = vcombine.high %v107_v63, %v111_v1  ;;  %v91_v20 = vld [vmem:[#allocation5 + $0x110] sm:$0xff] }
  0x25   :  { %v2986_v15 = vcombine.high %v89_v12, %v93_v13  ;;  %v81_v16 = vld [vmem:[#allocation5 + $0xc0] sm:$0xff]  ;;  %v2985_v27 = vcombine.low %v89_v12, %v93_v13  ;;  %v2988_v40 = vcombine.high %v90_v33, %v94_v34  ;;  %v82_v41 = vld [vmem:[#allocation5 + $0xc8] sm:$0xff]  ;;  %v2987_v46 = vcombine.low %v90_v33, %v94_v34  ;;  %v120_v12 = vld [vmem:[#allocation5 + $0x1f8] sm:$0xff]  ;;  %p3767_p0 = pnand %p3766_p13, %p3760_p10 }
  0x26   :  { %492 = vmatpush1.bf16.msra.mxu0 %v3001_v10  ;;  %v85_v19 = vld [vmem:[#allocation5 + $0xe0] sm:$0xff]  ;;  %605 = vmatpush1.bf16.msra.mxu1 %v3003_v29  ;;  %v86_v42 = vld [vmem:[#allocation5 + $0xe8] sm:$0xff]  ;;  %v103_v10 = vld [vmem:[#allocation5 + $0x170] sm:$0xff]  ;;  %v3005_v13 = vcombine.low %v107_v63, %v111_v1 }
  0x27   :  { %493 = vmatprep.subr.bf16.mxu0 %v2994_v11  ;;  %v2978_v28 = vcombine.high %v81_v16, %v85_v19  ;;  %v73_v30 = vld [vmem:[#allocation5 + $0x80] sm:$0xff]  ;;  %v2977_v35 = vcombine.low %v81_v16, %v85_v19  ;;  %606 = vmatprep.subr.bf16.mxu1 %v2996_v32  ;;  %v2980_v48 = vcombine.high %v82_v41, %v86_v42  ;;  %v74_v49 = vld [vmem:[#allocation5 + $0x88] sm:$0xff]  ;;  %v116_v11 = vld [vmem:[#allocation5 + $0x1d8] sm:$0xff] }
  0x28   :  { %v77_v31 = vld [vmem:[#allocation5 + $0xa0] sm:$0xff]  ;;  %v78_v50 = vld [vmem:[#allocation5 + $0xa8] sm:$0xff]  ;;  %v2979_v53 = vcombine.low %v82_v41, %v86_v42  ;;  %v3016_v16 = vcombine.high %v116_v11, %v120_v12  ;;  %v112_v19 = vld [vmem:[#allocation5 + $0x1b8] sm:$0xff]  ;;  %v3015_v22 = vcombine.low %v116_v11, %v120_v12  ;;  %v2997_v24 = vcombine.low %v99_v9, %v103_v10 }
  0x29   :  { %v2970_v36 = vcombine.high %v73_v30, %v77_v31  ;;  %v65_v38 = vld [vmem:[#allocation5 + $0x40] sm:$0xff]  ;;  %v2969_v43 = vcombine.low %v73_v30, %v77_v31  ;;  %v2972_v54 = vcombine.high %v74_v49, %v78_v50  ;;  %v66_v57 = vld [vmem:[#allocation5 + $0x48] sm:$0xff]  ;;  %v2971_v60 = vcombine.low %v74_v49, %v78_v50  ;;  %v95_v21 = vld [vmem:[#allocation5 + $0x130] sm:$0xff] }
  0x2a   :  { %494 = vmatpush1.bf16.msra.mxu0 %v2993_v14  ;;  %v69_v39 = vld [vmem:[#allocation5 + $0x60] sm:$0xff]  ;;  %607 = vmatpush1.bf16.msra.mxu1 %v2995_v37  ;;  %v70_v58 = vld [vmem:[#allocation5 + $0x68] sm:$0xff]  ;;  %v3008_v23 = vcombine.high %v108_v18, %v112_v19  ;;  %v100_v25 = vld [vmem:[#allocation5 + $0x158] sm:$0xff]  ;;  %v3007_v30 = vcombine.low %v108_v18, %v112_v19  ;;  %v2989_v32 = vcombine.low %v91_v20, %v95_v21 }
  0x2b   :  { %495 = vmatprep.subr.bf16.mxu0 %v2986_v15  ;;  %v2962_v44 = vcombine.high %v65_v38, %v69_v39  ;;  %v57_v45 = vld [vmem:[#allocation5] sm:$0xff]  ;;  %608 = vmatprep.subr.bf16.mxu1 %v2988_v40  ;;  %v2961_v51 = vcombine.low %v65_v38, %v69_v39  ;;  %v2964_v62 = vcombine.high %v66_v57, %v70_v58  ;;  %v58_v3 = vld [vmem:[#allocation5 + $0x8] sm:$0xff]  ;;  %v104_v26 = vld [vmem:[#allocation5 + $0x178] sm:$0xff] }
  0x2c   :  { %v61_v47 = vld [vmem:[#allocation5 + $0x20] sm:$0xff]  ;;  %v62_v4 = vld [vmem:[#allocation5 + $0x28] sm:$0xff]  ;;  %v2963_v6 = vcombine.low %v66_v57, %v70_v58  ;;  %v2998_v15 = vcombine.high %v99_v9, %v103_v10  ;;  %v87_v29 = vld [vmem:[#allocation5 + $0xf0] sm:$0xff]  ;;  %v3000_v31 = vcombine.high %v100_v25, %v104_v26  ;;  %v2999_v39 = vcombine.low %v100_v25, %v104_v26 }
  0x2d   :  { %v2954_v52 = vcombine.high %v57_v45, %v61_v47  ;;  %v2953_v59 = vcombine.low %v57_v45, %v61_v47  ;;  %v3818_v2 = vld [vmem:[#allocation2] sm:$0xff]   ;;  %v2956_v8 = vcombine.high %v58_v3, %v62_v4  ;;  %v2955_v14 = vcombine.low %v58_v3, %v62_v4  ;;  %v3822_v17 = vld [vmem:[#allocation2 + $0x8] sm:$0xff]   ;;  %v3828_v33 = vld [vmem:[#allocation2 + $0x10] sm:$0xff]  }
  0x2e   :  { %496 = vmatpush1.bf16.msra.mxu0 %v2985_v27  ;;  %609 = vmatpush1.bf16.msra.mxu1 %v2987_v46  ;;  %v2990_v27 = vcombine.high %v91_v20, %v95_v21  ;;  %v92_v34 = vld [vmem:[#allocation5 + $0x118] sm:$0xff]  ;;  %v75_v37 = vld [vmem:[#allocation5 + $0x90] sm:$0xff]  ;;  %v3840_v3 = vld [vmem:[#allocation2 + $0x20] sm:$0xff]  }
  0x2f   :  { %497 = vmatprep.subr.bf16.mxu0 %v2978_v28  ;;  %610 = vmatprep.subr.bf16.mxu1 %v2980_v48  ;;  %v83_v28 = vld [vmem:[#allocation5 + $0xd0] sm:$0xff]  ;;  %v84_v42 = vld [vmem:[#allocation5 + $0xd8] sm:$0xff]  ;;  %v3448_v9 = vld [vmem:[#allocation2 + $0x28] sm:$0xff]  }
  0x30   :  { %v79_v38 = vld [vmem:[#allocation5 + $0xb0] sm:$0xff]  ;;  %v2981_v41 = vcombine.low %v83_v28, %v87_v29  ;;  %v3834_v50 = vld [vmem:[#allocation2 + $0x18] sm:$0xff]  }
  0x31   :  { %v67_v45 = vld [vmem:[#allocation5 + $0x50] sm:$0xff]  ;;  %v2973_v49 = vcombine.low %v75_v37, %v79_v38  ;;  %v60_v4 = vld [vmem:[#allocation5 + $0x18] sm:$0xff] }
  0x32   :  { %498 = vmatpush1.bf16.msra.mxu0 %v2977_v35  ;;  %611 = vmatpush1.bf16.msra.mxu1 %v2979_v53  ;;  %v96_v35 = vld [vmem:[#allocation5 + $0x138] sm:$0xff]  ;;  %v71_v46 = vld [vmem:[#allocation5 + $0x70] sm:$0xff] }
  0x33   :  { %499 = vmatprep.subr.bf16.mxu0 %v2970_v36  ;;  %612 = vmatprep.subr.bf16.mxu1 %v2972_v54  ;;  %v2982_v36 = vcombine.high %v83_v28, %v87_v29  ;;  %v2992_v40 = vcombine.high %v92_v34, %v96_v35  ;;  %v2991_v47 = vcombine.low %v92_v34, %v96_v35  ;;  %v80_v53 = vld [vmem:[#allocation5 + $0xb8] sm:$0xff]  ;;  %v59_v54 = vld [vmem:[#allocation5 + $0x10] sm:$0xff] }
  0x34   :  { %v63_v55 = vld [vmem:[#allocation5 + $0x30] sm:$0xff]  ;;  %v2965_v57 = vcombine.low %v67_v45, %v71_v46  ;;  %v3853_v11 = vld [vmem:[#allocation2 + $0x38] sm:$0xff]  }
  0x35   :  { %v2957_v63 = vcombine.low %v59_v54, %v63_v55  ;;  %v3449_v10 = vld [vmem:[#allocation2 + $0x30] sm:$0xff]  }
  0x36   :  { %500 = vmatpush1.bf16.msra.mxu0 %v2969_v43  ;;  %613 = vmatpush1.bf16.msra.mxu1 %v2971_v60  ;;  %v88_v43 = vld [vmem:[#allocation5 + $0xf8] sm:$0xff] }
  0x37   :  { %501 = vmatprep.subr.bf16.mxu0 %v2962_v44  ;;  %614 = vmatprep.subr.bf16.mxu1 %v2964_v62  ;;  %v2974_v44 = vcombine.high %v75_v37, %v79_v38  ;;  %v2984_v48 = vcombine.high %v84_v42, %v88_v43  ;;  %v2983_v56 = vcombine.low %v84_v42, %v88_v43  ;;  %v68_v60 = vld [vmem:[#allocation5 + $0x58] sm:$0xff] }
  0x3a   :  { %502 = vmatpush1.bf16.msra.mxu0 %v2961_v51  ;;  %615 = vmatpush1.bf16.msra.mxu1 %v2963_v6  ;;  %v2966_v51 = vcombine.high %v67_v45, %v71_v46 }
  0x3b   :  { %503 = vmatprep.subr.bf16.mxu0 %v2954_v52  ;;  %616 = vmatprep.subr.bf16.mxu1 %v2956_v8  ;;  %v76_v52 = vld [vmem:[#allocation5 + $0x98] sm:$0xff] }
  0x3c   :  { %v2976_v58 = vcombine.high %v76_v52, %v80_v53  ;;  %v2975_v62 = vcombine.low %v76_v52, %v80_v53 }
  0x3e   :  { %504 = vmatpush1.bf16.msra.mxu0 %v2953_v59  ;;  %617 = vmatpush1.bf16.msra.mxu1 %v2955_v14  ;;  %v2958_v59 = vcombine.high %v59_v54, %v63_v55 }
  0x3f   :  { %715 = vmatprep.subr.bf16.mxu0 %v3014_v61  ;;  %828 = vmatprep.subr.bf16.mxu1 %v3016_v16  ;;  %v72_v61 = vld [vmem:[#allocation5 + $0x78] sm:$0xff] }
  0x40   :  { %v2968_v1 = vcombine.high %v68_v60, %v72_v61  ;;  %v2967_v6 = vcombine.low %v68_v60, %v72_v61 }
  0x41   :  { %522 = vmatmul.mubr.bf16.vlgmr.msra.gmra.mxu0 %v3818_v2  ;;  %635 = vmatmul.mubr.bf16.vlgmr.msra.gmra.mxu1 %v3818_v2 }
  0x42   :  { %531 = vmatprep.mubr.bf16.mxu0 %v3791_v0  ;;  %716 = vmatpush1.bf16.msra.mxu0 %v3013_v5  ;;  %v64_v5 = vld [vmem:[#allocation5 + $0x38] sm:$0xff] }
  0x43   :  { %717 = vmatprep.subr.bf16.mxu0 %v3006_v7  ;;  %829 = vmatpush1.bf16.msra.mxu1 %v3015_v22  ;;  %v2960_v7 = vcombine.high %v60_v4, %v64_v5  ;;  %v2959_v8 = vcombine.low %v60_v4, %v64_v5 }
  0x44   :  { %644 = vmatprep.mubr.bf16.mxu1 %v3791_v0  ;;  %830 = vmatprep.subr.bf16.mxu1 %v3008_v23 }
  0x46   :  { %718 = vmatpush1.bf16.msra.mxu0 %v3005_v13 }
  0x47   :  { %719 = vmatprep.subr.bf16.mxu0 %v2998_v15  ;;  %831 = vmatpush1.bf16.msra.mxu1 %v3007_v30 }
  0x48   :  { %832 = vmatprep.subr.bf16.mxu1 %v3000_v31 }
  0x49   :  { %532 = vmatmul.mubr.bf16.gmra.mxu0 %v3822_v17  ;;  %645 = vmatmul.mubr.bf16.gmra.mxu1 %v3822_v17 }
  0x4a   :  { %541 = vmatprep.mubr.bf16.mxu0 %v3791_v0  ;;  %720 = vmatpush1.bf16.msra.mxu0 %v2997_v24 }
  0x4b   :  { %721 = vmatprep.subr.bf16.mxu0 %v2990_v27  ;;  %654 = vmatprep.mubr.bf16.mxu1 %v3791_v0 }
  0x4c   :  { %833 = vmatpush1.bf16.msra.mxu1 %v2999_v39 }
  0x4d   :  { %834 = vmatprep.subr.bf16.mxu1 %v2992_v40 }
  0x4e   :  { %722 = vmatpush1.bf16.msra.mxu0 %v2989_v32 }
  0x4f   :  { %723 = vmatprep.subr.bf16.mxu0 %v2982_v36 }
  0x50   :  { %835 = vmatpush1.bf16.msra.mxu1 %v2991_v47 }
  0x51   :  { %542 = vmatmul.mubr.bf16.gmra.mxu0 %v3828_v33  ;;  %836 = vmatprep.subr.bf16.mxu1 %v2984_v48 }
  0x52   :  { %551 = vmatprep.mubr.bf16.mxu0 %v3791_v0  ;;  %724 = vmatpush1.bf16.msra.mxu0 %v2981_v41 }
  0x53   :  { %725 = vmatprep.subr.bf16.mxu0 %v2974_v44  ;;  %655 = vmatmul.mubr.bf16.gmra.mxu1 %v3828_v33 }
  0x54   :  { %664 = vmatprep.mubr.bf16.mxu1 %v3791_v0  ;;  %837 = vmatpush1.bf16.msra.mxu1 %v2983_v56 }
  0x55   :  { %838 = vmatprep.subr.bf16.mxu1 %v2976_v58 }
  0x56   :  { %726 = vmatpush1.bf16.msra.mxu0 %v2973_v49 }
  0x57   :  { %727 = vmatprep.subr.bf16.mxu0 %v2966_v51 }
  0x58   :  { %839 = vmatpush1.bf16.msra.mxu1 %v2975_v62 }
  0x59   :  { %552 = vmatmul.mubr.bf16.gmra.mxu0 %v3834_v50  ;;  %840 = vmatprep.subr.bf16.mxu1 %v2968_v1 }
  0x5a   :  { %561 = vmatprep.mubr.bf16.mxu0 %v3791_v0  ;;  %728 = vmatpush1.bf16.msra.mxu0 %v2965_v57 }
  0x5b   :  { %729 = vmatprep.subr.bf16.mxu0 %v2958_v59  ;;  %665 = vmatmul.mubr.bf16.gmra.mxu1 %v3834_v50 }
  0x5c   :  { %674 = vmatprep.mubr.bf16.mxu1 %v3791_v0  ;;  %841 = vmatpush1.bf16.msra.mxu1 %v2967_v6 }
  0x5d   :  { %842 = vmatprep.subr.bf16.mxu1 %v2960_v7 }
  0x5e   :  { %730 = vmatpush1.bf16.msra.mxu0 %v2957_v63 }
  0x5f   :  { %3177 = vmatprep.subr.bf16.mxu0 %v3834_v50 }
  0x60   :  { %843 = vmatpush1.bf16.msra.mxu1 %v2959_v8 }
  0x61   :  { %562 = vmatmul.mubr.bf16.gmra.mxu0 %v3840_v3  ;;  %3193 = vmatprep.subr.bf16.mxu1 %v3834_v50 }
  0x62   :  { %571 = vmatprep.mubr.bf16.mxu0 %v3791_v0 }
  0x63   :  { %675 = vmatmul.mubr.bf16.gmra.mxu1 %v3840_v3 }
  0x64   :  { %684 = vmatprep.mubr.bf16.mxu1 %v3791_v0 }
  0x69   :  { %572 = vmatmul.mubr.bf16.gmra.mxu0 %v3448_v9 }
  0x6a   :  { %581 = vmatprep.mubr.bf16.mxu0 %v3791_v0 }
  0x6b   :  { %685 = vmatmul.mubr.bf16.gmra.mxu1 %v3448_v9 }
  0x6c   :  { %694 = vmatprep.mubr.bf16.mxu1 %v3791_v0 }
  0x71   :  { %582 = vmatmul.mubr.bf16.gmra.mxu0 %v3449_v10 }
  0x72   :  { %591 = vmatprep.mubr.bf16.mxu0 %v3791_v0 }
  0x73   :  { %695 = vmatmul.mubr.bf16.gmra.mxu1 %v3449_v10 }
  0x74   :  { %704 = vmatprep.mubr.bf16.mxu1 %v3791_v0 }
  0x79   :  { %592 = vmatmul.mubr.bf16.gmra.mxu0 %v3853_v11 }
  0x7a   :  { %747 = vmatprep.mubr.bf16.mxu0 %v3791_v0 }
  0x7b   :  { %705 = vmatmul.mubr.bf16.gmra.mxu1 %v3853_v11 }
  0x7c   :  { %860 = vmatprep.mubr.bf16.mxu1 %v3791_v0 }
  0x81   :  { %748 = vmatmul.mubr.bf16.vlgmr.msra.gmra.mxu0 %v3818_v2 }
  0x82   :  { %757 = vmatprep.mubr.bf16.mxu0 %v3791_v0  ;;  %3178 = vmatpush3.bf16.xpose.msra.mxu0 %v3834_v50 }
  0x83   :  { %3179 = vmatprep.subr.bf16.mxu0 %v3828_v33  ;;  %861 = vmatmul.mubr.bf16.vlgmr.msra.gmra.mxu1 %v3818_v2 }
  0x84   :  { %3194 = vmatpush3.bf16.xpose.msra.mxu1 %v3834_v50  ;;  %870 = vmatprep.mubr.bf16.mxu1 %v3791_v0 }
  0x85   :  { %3195 = vmatprep.subr.bf16.mxu1 %v3828_v33 }
  0x89   :  { %758 = vmatmul.mubr.bf16.gmra.mxu0 %v3822_v17 }
  0x8a   :  { %767 = vmatprep.mubr.bf16.mxu0 %v3791_v0  ;;  %3180 = vmatpush3.bf16.xpose.msra.mxu0 %v3828_v33 }
  0x8b   :  { %3181 = vmatprep.subr.bf16.mxu0 %v3822_v17  ;;  %871 = vmatmul.mubr.bf16.gmra.mxu1 %v3822_v17 }
  0x8c   :  { %880 = vmatprep.mubr.bf16.mxu1 %v3791_v0  ;;  %3196 = vmatpush3.bf16.xpose.msra.mxu1 %v3828_v33 }
  0x8d   :  { %3197 = vmatprep.subr.bf16.mxu1 %v3822_v17 }
  0x91   :  { %768 = vmatmul.mubr.bf16.gmra.mxu0 %v3828_v33 }
  0x92   :  { %777 = vmatprep.mubr.bf16.mxu0 %v3791_v0  ;;  %3182 = vmatpush3.bf16.xpose.msra.mxu0 %v3822_v17 }
  0x93   :  { %3183 = vmatprep.subr.bf16.mxu0 %v3818_v2  ;;  %881 = vmatmul.mubr.bf16.gmra.mxu1 %v3828_v33 }
  0x94   :  { %890 = vmatprep.mubr.bf16.mxu1 %v3791_v0  ;;  %3198 = vmatpush3.bf16.xpose.msra.mxu1 %v3822_v17 }
  0x95   :  { %3199 = vmatprep.subr.bf16.mxu1 %v3818_v2 }
  0x99   :  { %778 = vmatmul.mubr.bf16.gmra.mxu0 %v3834_v50 }
  0x9a   :  { %787 = vmatprep.mubr.bf16.mxu0 %v3791_v0  ;;  %3184 = vmatpush3.bf16.xpose.msra.mxu0 %v3818_v2 }
  0x9b   :  { %891 = vmatmul.mubr.bf16.gmra.mxu1 %v3834_v50 }
  0x9c   :  { %900 = vmatprep.mubr.bf16.mxu1 %v3791_v0  ;;  %3200 = vmatpush3.bf16.xpose.msra.mxu1 %v3818_v2 }
  0xa1   :  { %788 = vmatmul.mubr.bf16.gmra.mxu0 %v3840_v3 }
  0xa2   :  { %797 = vmatprep.mubr.bf16.mxu0 %v3791_v0 }
  0xa3   :  { %901 = vmatmul.mubr.bf16.gmra.mxu1 %v3840_v3 }
  0xa4   :  { %910 = vmatprep.mubr.bf16.mxu1 %v3791_v0 }
  0xa9   :  { %798 = vmatmul.mubr.bf16.gmra.mxu0 %v3448_v9 }
  0xaa   :  { %807 = vmatprep.mubr.bf16.mxu0 %v3791_v0 }
  0xab   :  { %911 = vmatmul.mubr.bf16.gmra.mxu1 %v3448_v9 }
  0xac   :  { %920 = vmatprep.mubr.bf16.mxu1 %v3791_v0 }
  0xb1   :  { %808 = vmatmul.mubr.bf16.gmra.mxu0 %v3449_v10 }
  0xb2   :  { %817 = vmatprep.mubr.bf16.mxu0 %v3791_v0 }
  0xb3   :  { %921 = vmatmul.mubr.bf16.gmra.mxu1 %v3449_v10 }
  0xb4   :  { %930 = vmatprep.mubr.bf16.mxu1 %v3791_v0 }
  0xb9   :  { %818 = vmatmul.mubr.bf16.gmra.mxu0 %v3853_v11 }
  0xbb   :  { %931 = vmatmul.mubr.bf16.gmra.mxu1 %v3853_v11 }
 0x101   :  { %v523_v2 = vpop.f32.mrf.mxu0  ;;  %v3900_v18 = vpop.f32.mrf.mxu1 }
 0x103   :  { %v525_v12 = vpop.f32.mrf.mxu0  ;;  %v3902_v20 = vpop.f32.mrf.mxu1 }
 0x105   :  { %v527_v13 = vpop.f32.mrf.mxu0  ;;  %v3904_v23 = vpop.f32.mrf.mxu1 }
 0x106   :  { %v941_v14 = vpack.c.bf16 %v527_v13, %v523_v2 }
 0x107   :  { %v529_v15 = vpop.f32.mrf.mxu0  ;;  %v3908_v26 = vpop.f32.mrf.mxu1 }
 0x108   :  { %v942_v16 = vpack.c.bf16 %v529_v15, %v525_v12  ;;  %3185 = vmatprep.mubr.bf16.mxu0 %v941_v14 }
 0x109   :  { %v533_v17 = vpop.f32.mrf.mxu0  ;;  %v3910_v28 = vpop.f32.mrf.mxu1 }
 0x10a   :  { %3201 = vmatprep.mubr.bf16.mxu1 %v942_v16 }
 0x10b   :  { %v535_v19 = vpop.f32.mrf.mxu0  ;;  %v3912_v30 = vpop.f32.mrf.mxu1 }
 0x10d   :  { %v537_v21 = vpop.f32.mrf.mxu0  ;;  %v3914_v34 = vpop.f32.mrf.mxu1 }
 0x10e   :  { %v949_v22 = vpack.c.bf16 %v537_v21, %v533_v17 }
 0x10f   :  { %v539_v0 = vpop.f32.mrf.mxu0  ;;  %v3918_v38 = vpop.f32.mrf.mxu1 }
 0x110   :  { %v950_v25 = vpack.c.bf16 %v539_v0, %v535_v19  ;;  %3186 = vmatmul.mubr.bf16.vlgmr.msra.gmra.mxu0 %v949_v22 }
 0x111   :  { %v543_v27 = vpop.f32.mrf.mxu0 }
 0x112   :  { %3202 = vmatmul.mubr.bf16.vlgmr.msra.gmra.mxu1 %v950_v25 }
 0x113   :  { %v545_v29 = vpop.f32.mrf.mxu0  ;;  %v3920_v40 = vpop.f32.mrf.mxu1 }
 0x115   :  { %v547_v31 = vpop.f32.mrf.mxu0  ;;  %v3922_v42 = vpop.f32.mrf.mxu1 }
 0x116   :  { %v957_v32 = vpack.c.bf16 %v547_v31, %v543_v27 }
 0x117   :  { %v549_v35 = vpop.f32.mrf.mxu0  ;;  %v3924_v45 = vpop.f32.mrf.mxu1 }
 0x118   :  { %v958_v37 = vpack.c.bf16 %v549_v35, %v545_v29  ;;  %3189 = vmatprep.mubr.bf16.mxu0 %v957_v32 }
 0x119   :  { %v553_v39 = vpop.f32.mrf.mxu0  ;;  %v3928_v49 = vpop.f32.mrf.mxu1 }
 0x11a   :  { %3205 = vmatprep.mubr.bf16.mxu1 %v958_v37 }
 0x11b   :  { %v555_v41 = vpop.f32.mrf.mxu0  ;;  %v3932_v52 = vpop.f32.mrf.mxu1 }
 0x11d   :  { %v557_v43 = vpop.f32.mrf.mxu0  ;;  %v3936_v54 = vpop.f32.mrf.mxu1 }
 0x11e   :  { %v965_v44 = vpack.c.bf16 %v557_v43, %v553_v39 }
 0x11f   :  { %v559_v46 = vpop.f32.mrf.mxu0  ;;  %v3942_v57 = vpop.f32.mrf.mxu1 }
 0x120   :  { %v966_v48 = vpack.c.bf16 %v559_v46, %v555_v41  ;;  %3190 = vmatmul.mubr.bf16.gmra.mxu0 %v965_v44 }
 0x121   :  { %v3930_v51 = vpop.f32.mrf.mxu0  ;;  %v3950_v61 = vpop.f32.mrf.mxu1 }
 0x122   :  { %4924 = vst [vmem:[#allocation11_spill] sm:$0xff] %v3930_v51  ;;  %3206 = vmatmul.mubr.bf16.gmra.mxu1 %v966_v48 }
 0x123   :  { %v3934_v53 = vpop.f32.mrf.mxu0  ;;  %v3954_v63 = vpop.f32.mrf.mxu1 }
 0x124   :  { %4927 = vst [vmem:[#allocation14_spill] sm:$0xff] %v3954_v63 }
 0x125   :  { %v3938_v55 = vpop.f32.mrf.mxu0  ;;  %v3958_v3 = vpop.f32.mrf.mxu1 }
 0x126   :  { %4925 = vst [vmem:[#allocation12_spill] sm:$0xff] %v3938_v55  ;;  %4928 = vst [vmem:[#allocation15_spill] sm:$0xff] %v3958_v3 }
 0x127   :  { %v3944_v58 = vpop.f32.mrf.mxu0  ;;  %v3964_v6 = vpop.f32.mrf.mxu1 }
 0x128   :  { %4930 = vst [vmem:[#allocation17_spill] sm:$0xff] %v3964_v6 }
 0x129   :  { %v3952_v62 = vpop.f32.mrf.mxu0  ;;  %v3972_v10 = vpop.f32.mrf.mxu1 }
 0x12a   :  { %4926 = vst [vmem:[#allocation13_spill] sm:$0xff] %v3952_v62  ;;  %4931 = vst [vmem:[#allocation18_spill] sm:$0xff] %v3972_v10 }
 0x12b   :  { %v3956_v1 = vpop.f32.mrf.mxu0  ;;  %v3978_v13 = vpop.f32.mrf.mxu1 }
 0x12c   :  { %4933 = vst [vmem:[#allocation20_spill] sm:$0xff] %v3978_v13 }
 0x12d   :  { %v3960_v4 = vpop.f32.mrf.mxu0  ;;  %v3982_v15 = vpop.f32.mrf.mxu1 }
 0x12e   :  { %4929 = vst [vmem:[#allocation16_spill] sm:$0xff] %v3960_v4  ;;  %4934 = vst [vmem:[#allocation21_spill] sm:$0xff] %v3982_v15 }
 0x12f   :  { %v3966_v7 = vpop.f32.mrf.mxu0  ;;  %v3988_v19 = vpop.f32.mrf.mxu1 }
 0x130   :  { %4936 = vst [vmem:[#allocation23_spill] sm:$0xff] %v3988_v19 }
 0x131   :  { %v3974_v2 = vpop.f32.mrf.mxu0  ;;  %v3996_v25 = vpop.f32.mrf.mxu1 }
 0x132   :  { %4932 = vst [vmem:[#allocation19_spill] sm:$0xff] %v3974_v2  ;;  %4937 = vst [vmem:[#allocation24_spill] sm:$0xff] %v3996_v25 }
 0x133   :  { %v3980_v14 = vpop.f32.mrf.mxu0  ;;  %v4002_v31 = vpop.f32.mrf.mxu1 }
 0x134   :  { %4939 = vst [vmem:[#allocation26_spill] sm:$0xff] %v4002_v31 }
 0x135   :  { %v3984_v16 = vpop.f32.mrf.mxu0  ;;  %v4006_v35 = vpop.f32.mrf.mxu1 }
 0x136   :  { %4935 = vst [vmem:[#allocation22_spill] sm:$0xff] %v3984_v16  ;;  %4941 = vst [vmem:[#allocation28_spill] sm:$0xff] %v4006_v35 }
 0x137   :  { %v3990_v21 = vpop.f32.mrf.mxu0  ;;  %v4012_v41 = vpop.f32.mrf.mxu1 }
 0x138   :  { %4943 = vst [vmem:[#allocation30_spill] sm:$0xff] %v4012_v41 }
 0x139   :  { %v3998_v27 = vpop.f32.mrf.mxu0  ;;  %v4020_v48 = vpop.f32.mrf.mxu1 }
 0x13a   :  { %4938 = vst [vmem:[#allocation25_spill] sm:$0xff] %v3998_v27  ;;  %4945 = vst [vmem:[#allocation32_spill] sm:$0xff] %v4020_v48 }
 0x13b   :  { %v4004_v32 = vpop.f32.mrf.mxu0  ;;  %v4024_v22 = vpop.f32.mrf.mxu1 }
 0x13c   :  { %4940 = vst [vmem:[#allocation27_spill] sm:$0xff] %v4004_v32  ;;  %4946 = vst [vmem:[#allocation33_spill] sm:$0xff] %v4024_v22 }
 0x13d   :  { %v4008_v37 = vpop.f32.mrf.mxu0  ;;  %v4026_v39 = vpop.f32.mrf.mxu1 }
 0x13e   :  { %4942 = vst [vmem:[#allocation29_spill] sm:$0xff] %v4008_v37  ;;  %4947 = vst [vmem:[#allocation34_spill] sm:$0xff] %v4026_v39 }
 0x13f   :  { %v4014_v43 = vpop.f32.mrf.mxu0  ;;  %v4028_v5 = vpop.f32.mrf.mxu1 }
 0x140   :  { %4944 = vst [vmem:[#allocation31_spill] sm:$0xff] %v4014_v43  ;;  %4948 = vst [vmem:[#allocation35_spill] sm:$0xff] %v4028_v5 }
 0x141   :  { %v749_v29 = vpop.f32.mrf.mxu0  ;;  %v4032_v0 = vpop.f32.mrf.mxu1 }
 0x142   :  { %4949 = vst [vmem:[#allocation36_spill] sm:$0xff] %v4032_v0 }
 0x143   :  { %v751_v8 = vpop.f32.mrf.mxu0  ;;  %v862_v60 = vpop.f32.mrf.mxu1 }
 0x145   :  { %v753_v17 = vpop.f32.mrf.mxu0  ;;  %v864_v59 = vpop.f32.mrf.mxu1 }
 0x147   :  { %v755_v56 = vpop.f32.mrf.mxu0  ;;  %v866_v36 = vpop.f32.mrf.mxu1 }
 0x148   :  { %v4036_v35 = vpack.c.bf16 %v866_v36, %v862_v60 }
 0x149   :  { %v759_v46 = vpop.f32.mrf.mxu0  ;;  %v868_v48 = vpop.f32.mrf.mxu1 }
 0x14a   :  { %v4038_v25 = vpack.c.bf16 %v868_v48, %v864_v59 }
 0x14b   :  { %v761_v12 = vpop.f32.mrf.mxu0  ;;  %v872_v3 = vpop.f32.mrf.mxu1 }
 0x14d   :  { %v763_v47 = vpop.f32.mrf.mxu0  ;;  %v874_v10 = vpop.f32.mrf.mxu1 }
 0x14f   :  { %v765_v24 = vpop.f32.mrf.mxu0  ;;  %v876_v5 = vpop.f32.mrf.mxu1 }
 0x150   :  { %v4040_v41 = vpack.c.bf16 %v876_v5, %v872_v3 }
 0x151   :  { %v769_v15 = vpop.f32.mrf.mxu0  ;;  %v878_v9 = vpop.f32.mrf.mxu1 }
 0x152   :  { %v4042_v0 = vpack.c.bf16 %v878_v9, %v874_v10  ;;  %v953_v9 = vpack.c.bf16 %v763_v47, %v759_v46 }
 0x153   :  { %v771_v44 = vpop.f32.mrf.mxu0  ;;  %v882_v13 = vpop.f32.mrf.mxu1 }
 0x155   :  { %v773_v22 = vpop.f32.mrf.mxu0  ;;  %v884_v36 = vpop.f32.mrf.mxu1 }
 0x156   :  { %v961_v63 = vpack.c.bf16 %v773_v22, %v769_v15  ;;  %v954_v15 = vpack.c.bf16 %v765_v24, %v761_v12 }
 0x157   :  { %v775_v31 = vpop.f32.mrf.mxu0  ;;  %v886_v59 = vpop.f32.mrf.mxu1 }
 0x158   :  { %v4044_v48 = vpack.c.bf16 %v886_v59, %v882_v13  ;;  %v962_v37 = vpack.c.bf16 %v775_v31, %v771_v44 }
 0x159   :  { %v779_v39 = vpop.f32.mrf.mxu0  ;;  %v888_v2 = vpop.f32.mrf.mxu1 }
 0x15a   :  { %v4046_v3 = vpack.c.bf16 %v888_v2, %v884_v36  ;;  %v946_v2 = vpack.c.bf16 %v755_v56, %v751_v8 }
 0x15b   :  { %v781_v19 = vpop.f32.mrf.mxu0  ;;  %v892_v10 = vpop.f32.mrf.mxu1 }
 0x15d   :  { %v783_v60 = vpop.f32.mrf.mxu0  ;;  %v894_v22 = vpop.f32.mrf.mxu1 }
 0x15e   :  { %v969_v6 = vpack.c.bf16 %v783_v60, %v779_v39  ;;  %v945_v39 = vpack.c.bf16 %v753_v17, %v749_v29 }
 0x15f   :  { %v785_v27 = vpop.f32.mrf.mxu0  ;;  %v896_v31 = vpop.f32.mrf.mxu1 }
 0x160   :  { %3225 = vmatprep.subr.bf16.mxu1 %v969_v6  ;;  %v970_v16 = vpack.c.bf16 %v785_v27, %v781_v19  ;;  %v4054_v12 = vpack.c.bf16 %v896_v31, %v892_v10 }
 0x161   :  { %3226 = vmatpush3.bf16.msra.mxu1 %v969_v6  ;;  %v789_v5 = vpop.f32.mrf.mxu0  ;;  %v898_v19 = vpop.f32.mrf.mxu1 }
 0x162   :  { %3227 = vmatprep.subr.bf16.mxu1 %v961_v63  ;;  %3209 = vmatprep.subr.bf16.mxu0 %v970_v16  ;;  %v4052_v27 = vpack.c.bf16 %v898_v19, %v894_v22 }
 0x163   :  { %v791_v62 = vpop.f32.mrf.mxu0  ;;  %3210 = vmatpush3.bf16.msra.mxu0 %v970_v16 }
 0x164   :  { %3211 = vmatprep.subr.bf16.mxu0 %v962_v37 }
 0x165   :  { %3228 = vmatpush3.bf16.msra.mxu1 %v961_v63  ;;  %v793_v13 = vpop.f32.mrf.mxu0  ;;  %v902_v63 = vpop.f32.mrf.mxu1 }
 0x166   :  { %3229 = vmatprep.subr.bf16.mxu1 %v953_v9  ;;  %v4048_v44 = vpack.c.bf16 %v793_v13, %v789_v5 }
 0x167   :  { %v795_v6 = vpop.f32.mrf.mxu0  ;;  %3212 = vmatpush3.bf16.msra.mxu0 %v962_v37  ;;  %v904_v17 = vpop.f32.mrf.mxu1 }
 0x168   :  { %4950 = vst [vmem:[#allocation37_spill] sm:$0xff] %v4048_v44  ;;  %v4050_v47 = vpack.c.bf16 %v795_v6, %v791_v62  ;;  %3213 = vmatprep.subr.bf16.mxu0 %v954_v15 }
 0x169   :  { %3230 = vmatpush3.bf16.msra.mxu1 %v953_v9  ;;  %v799_v24 = vpop.f32.mrf.mxu0  ;;  %v906_v56 = vpop.f32.mrf.mxu1 }
 0x16a   :  { %4951 = vst [vmem:[#allocation38_spill] sm:$0xff] %v4050_v47  ;;  %3231 = vmatprep.subr.bf16.mxu1 %v945_v39  ;;  %v4059_v8 = vpack.c.bf16 %v906_v56, %v902_v63 }
 0x16b   :  { %v801_v16 = vpop.f32.mrf.mxu0  ;;  %3214 = vmatpush3.bf16.msra.mxu0 %v954_v15  ;;  %v908_v46 = vpop.f32.mrf.mxu1 }
 0x16c   :  { %3215 = vmatprep.subr.bf16.mxu0 %v946_v2  ;;  %4953 = vst [vmem:[#allocation40_spill] sm:$0xff] %v4059_v8  ;;  %v4064_v60 = vpack.c.bf16 %v908_v46, %v904_v17 }
 0x16d   :  { %3232 = vmatpush3.bf16.msra.mxu1 %v945_v39  ;;  %v803_v29 = vpop.f32.mrf.mxu0  ;;  %v912_v5 = vpop.f32.mrf.mxu1 }
 0x16e   :  { %3257 = vmatprep.subr.bf16.mxu1 %v4054_v12  ;;  %v4057_v62 = vpack.c.bf16 %v803_v29, %v799_v24  ;;  %4955 = vst [vmem:[#allocation42_spill] sm:$0xff] %v4064_v60 }
 0x16f   :  { %v805_v37 = vpop.f32.mrf.mxu0  ;;  %3216 = vmatpush3.bf16.msra.mxu0 %v946_v2  ;;  %v914_v10 = vpop.f32.mrf.mxu1 }
 0x170   :  { %4952 = vst [vmem:[#allocation39_spill] sm:$0xff] %v4057_v62  ;;  %v4061_v36 = vpack.c.bf16 %v805_v37, %v801_v16  ;;  %3241 = vmatprep.subr.bf16.mxu0 %v3834_v50 }
 0x171   :  { %v809_v59 = vpop.f32.mrf.mxu0  ;;  %v916_v22 = vpop.f32.mrf.mxu1 }
 0x172   :  { %4954 = vst [vmem:[#allocation41_spill] sm:$0xff] %v4061_v36  ;;  %v4068_v39 = vpack.c.bf16 %v916_v22, %v912_v5 }
 0x173   :  { %v811_v9 = vpop.f32.mrf.mxu0  ;;  %v918_v6 = vpop.f32.mrf.mxu1 }
 0x174   :  { %4957 = vst [vmem:[#allocation44_spill] sm:$0xff] %v4068_v39  ;;  %v4072_v19 = vpack.c.bf16 %v918_v6, %v914_v10 }
 0x175   :  { %v813_v15 = vpop.f32.mrf.mxu0  ;;  %v922_v63 = vpop.f32.mrf.mxu1 }
 0x176   :  { %v4066_v13 = vpack.c.bf16 %v813_v15, %v809_v59  ;;  %4959 = vst [vmem:[#allocation46_spill] sm:$0xff] %v4072_v19 }
 0x177   :  { %v815_v31 = vpop.f32.mrf.mxu0  ;;  %v924_v17 = vpop.f32.mrf.mxu1 }
 0x178   :  { %4956 = vst [vmem:[#allocation43_spill] sm:$0xff] %v4066_v13  ;;  %v4070_v2 = vpack.c.bf16 %v815_v31, %v811_v9 }
 0x179   :  { %v819_v24 = vpop.f32.mrf.mxu0  ;;  %v926_v56 = vpop.f32.mrf.mxu1 }
 0x17a   :  { %4958 = vst [vmem:[#allocation45_spill] sm:$0xff] %v4070_v2  ;;  %v4078_v46 = vpack.c.bf16 %v926_v56, %v922_v63 }
 0x17b   :  { %v4074_v16 = vpop.f32.mrf.mxu0  ;;  %v928_v59 = vpop.f32.mrf.mxu1 }
 0x17c   :  { %4960 = vst [vmem:[#allocation47_spill] sm:$0xff] %v4074_v16  ;;  %4961 = vst [vmem:[#allocation48_spill] sm:$0xff] %v4078_v46  ;;  %v4080_v5 = vpack.c.bf16 %v928_v59, %v924_v17 }
 0x17d   :  { %v823_v29 = vpop.f32.mrf.mxu0  ;;  %v932_v15 = vpop.f32.mrf.mxu1 }
 0x17e   :  { %v4076_v37 = vpack.c.bf16 %v823_v29, %v819_v24  ;;  %4962 = vst [vmem:[#allocation49_spill] sm:$0xff] %v4080_v5 }
 0x17f   :  { %v4082_v22 = vpop.f32.mrf.mxu1 }
 0x180   :  { %4963 = vst [vmem:[#allocation50_spill] sm:$0xff] %v4082_v22 }
 0x181   :  { %v936_v9 = vpop.f32.mrf.mxu1 }
 0x182   :  { %v4084_v10 = vpack.c.bf16 %v936_v9, %v932_v15 }
 0x183   :  { %v4086_v31 = vpop.f32.mrf.mxu1 }
 0x184   :  { %4964 = vst [vmem:[#allocation51_spill] sm:$0xff] %v4084_v10  ;;  %4965 = vst [vmem:[#allocation52_spill] sm:$0xff] %v4086_v31 }
 0x1d2   :  { %v3203_v6 = vpop.f32.mrf.mxu1 }
 0x1d3   :  { %v1234_v8 = vsel %vm1070_vm0, %v3203_v6, -inf }
 0x1d4   :  { %1235 = vmax.xlane.f32.xlu1 %v1234_v8  ;;  %v1197_v24 = vpop.f32.mrf.mxu1 }
 0x1d5   :  { %v1228_v63 = vsel %vm1070_vm0, %v1197_v24, -inf }
 0x1d6   :  { %1229 = vmax.xlane.f32.xlu0 %v1228_v63  ;;  %v3204_v29 = vpop.f32.mrf.mxu1 }
 0x1d7   :  { %v1237_v17 = vsel %vm1070_vm0, %v3204_v29, -inf }
 0x1d8   :  { %1238 = vmax.xlane.f32.xlu1 %v1237_v17  ;;  %v1200_v56 = vpop.f32.mrf.mxu1 }
 0x1d9   :  { %v1231_v59 = vsel %vm1070_vm0, %v1200_v56, -inf }
 0x1da   :  { %1232 = vmax.xlane.f32.xlu0 %v1231_v59 }
 0x1e2   :  { %v3207_v15 = vpop.f32.mrf.mxu1 }
 0x1e3   :  { %v1246_v8 = vsel %vm1070_vm0, %v3207_v15, -inf }
 0x1e4   :  { %v1213_v9 = vpop.f32.mrf.mxu1 }
 0x1e5   :  { %v1240_v39 = vsel %vm1070_vm0, %v1213_v9, -inf }
 0x1e6   :  { %1241 = vmax.xlane.f32.xlu0 %v1240_v39  ;;  %v3208_v46 = vpop.f32.mrf.mxu1 }
 0x1e7   :  { %v1249_v63 = vsel %vm1070_vm0, %v3208_v46, -inf }
 0x1e8   :  { %v1216_v60 = vpop.f32.mrf.mxu1 }
 0x1e9   :  { %v1243_v19 = vsel %vm1070_vm0, %v1216_v60, -inf }
 0x1ea   :  { %1247 = vmax.xlane.f32.xlu0 %v1246_v8  ;;  %1244 = vmax.xlane.f32.xlu1 %v1243_v19 }
 0x1ee   :  { %1250 = vmax.xlane.f32.xlu1 %v1249_v63 }
 0x25d   :  { %v1236_v17 = vpop.xlane.xlu1 %1235 }
 0x25e   :  { %v1254_v5 = vsub.f32 %v3203_v6, %v1236_v17 }
 0x25f   :  { %v1230_v31 = vpop.xlane.xlu0 %1229 }
 0x260   :  { %v1252_v59 = vsub.f32 %v1197_v24, %v1230_v31  ;;  %v1264_v47 = vmul.f32 1.442695, %v1254_v5 }
 0x261   :  { %v1239_v22 = vpop.xlane.xlu1 %1238 }
 0x262   :  { %v1260_v36 = vmul.f32 1.442695, %v1252_v59  ;;  %v1255_v2 = vsub.f32 %v3204_v29, %v1239_v22 }
 0x263   :  { %v1233_v39 = vpop.xlane.xlu0 %1232 }
 0x264   :  { %3451 = vpow2.f32 %v1260_v36  ;;  %v1253_v4 = vsub.f32 %v1200_v56, %v1233_v39  ;;  %v1266_v16 = vmul.f32 1.442695, %v1255_v2 }
 0x265   :  { %3453 = vpow2.f32 %v1264_v47 }
 0x266   :  { %v1262_v51 = vmul.f32 1.442695, %v1253_v4 }
 0x268   :  { %3455 = vpow2.f32 %v1262_v51  ;;  %v4104_v51 = vpop.f32.mrf.mxu0 }
 0x269   :  { %3457 = vpow2.f32 %v1266_v16  ;;  %4966 = vst [vmem:[#allocation53_spill] sm:$0xff] %v4104_v51 }
 0x26f   :  { %v1242_v19 = vpop.xlane.xlu0 %1241 }
 0x270   :  { %v1256_v8 = vsub.f32 %v1213_v9, %v1242_v19 }
 0x271   :  { %v4096_v55 = vpop.eup %3451 }
 0x272   :  { %v1268_v63 = vmul.f32 1.442695, %v1256_v8  ;;  %v1276_v31 = vsel %vm1070_vm0, %v4096_v55, 0.0  ;;  %v4100_v6 = vpop.eup %3453 }
 0x273   :  { %1277 = vadd.xlane.f32.xlu0 %v1276_v31  ;;  %v1248_v5 = vpop.xlane.xlu0 %1247  ;;  %v1245_v22 = vpop.xlane.xlu1 %1244  ;;  %v1282_v24 = vsel %vm1070_vm0, %v4100_v6, 0.0 }
 0x274   :  { %3459 = vpow2.f32 %v1268_v63  ;;  %v1258_v36 = vsub.f32 %v3207_v15, %v1248_v5  ;;  %v1257_v47 = vsub.f32 %v1216_v60, %v1245_v22  ;;  %v4112_v60 = vpop.f32.mrf.mxu0 }
 0x275   :  { %v4102_v2 = vpop.eup %3455 }
 0x276   :  { %v1272_v4 = vmul.f32 1.442695, %v1258_v36  ;;  %v1270_v16 = vmul.f32 1.442695, %v1257_v47  ;;  %v1279_v29 = vsel %vm1070_vm0, %v4102_v2, 0.0  ;;  %v4110_v56 = vpop.eup %3457  ;;  %v4116_v39 = vpop.f32.mrf.mxu0 }
 0x277   :  { %1283 = vadd.xlane.f32.xlu0 %v1282_v24  ;;  %1280 = vadd.xlane.f32.xlu1 %v1279_v29  ;;  %v1251_v9 = vpop.xlane.xlu1 %1250  ;;  %v1285_v59 = vsel %vm1070_vm0, %v4110_v56, 0.0  ;;  %v1071_v24 = vsel %vm1070_vm0, %v4116_v39, -inf }
 0x278   :  { %3461 = vpow2.f32 %v1272_v4  ;;  %v1259_v15 = vsub.f32 %v3208_v46, %v1251_v9  ;;  %v4120_v8 = vpop.f32.mrf.mxu0  ;;  %v1077_v9 = vsel %vm1070_vm0, %v4112_v60, -inf }
 0x279   :  { %3463 = vpow2.f32 %v1270_v16 }
 0x27a   :  { %v1274_v17 = vmul.f32 1.442695, %v1259_v15  ;;  %v4128_v5 = vpop.f32.mrf.mxu0 }
 0x27b   :  { %1286 = vadd.xlane.f32.xlu1 %v1285_v59  ;;  %v1074_v15 = vsel %vm1070_vm0, %v4128_v5, -inf }
 0x27c   :  { %3465 = vpow2.f32 %v1274_v17  ;;  %v4134_v47 = vpop.f32.mrf.mxu0 }
 0x27e   :  { %v4142_v29 = vpop.f32.mrf.mxu0 }
 0x27f   :  { %v1083_v59 = vsel %vm1070_vm0, %v4142_v29, -inf }
 0x280   :  { %v4148_v17 = vpop.f32.mrf.mxu0 }
 0x281   :  { %v4118_v19 = vpop.eup %3459 }
 0x282   :  { %v1288_v63 = vsel %vm1070_vm0, %v4118_v19, 0.0 }
 0x283   :  { %1289 = vadd.xlane.f32.xlu0 %v1288_v63  ;;  %v1080_v63 = vsel %vm1070_vm0, %v4120_v8, -inf }
 0x285   :  { %v4124_v46 = vpop.eup %3461 }
 0x286   :  { %v4126_v31 = vpop.eup %3463  ;;  %v1294_v22 = vsel %vm1070_vm0, %v4124_v46, 0.0 }
 0x287   :  { %1295 = vadd.xlane.f32.xlu0 %v1294_v22  ;;  %v1291_v36 = vsel %vm1070_vm0, %v4126_v31, 0.0  ;;  %v4154_v22 = vpop.f32.mrf.mxu0 }
 0x288   :  { %1292 = vadd.xlane.f32.xlu1 %v1291_v36  ;;  %v1089_v36 = vsel %vm1070_vm0, %v4134_v47, -inf }
 0x289   :  { %v4136_v4 = vpop.eup %3465 }
 0x28a   :  { %v1297_v16 = vsel %vm1070_vm0, %v4136_v4, 0.0 }
 0x28b   :  { %1072 = vmax.xlane.f32.xlu0 %v1071_v24  ;;  %v1092_v24 = vsel %vm1070_vm0, %v4148_v17, -inf }
 0x28c   :  { %1298 = vadd.xlane.f32.xlu1 %v1297_v16  ;;  %v1086_v16 = vsel %vm1070_vm0, %v4154_v22, -inf }
 0x28f   :  { %1078 = vmax.xlane.f32.xlu0 %v1077_v9 }
 0x290   :  { %1075 = vmax.xlane.f32.xlu1 %v1074_v15 }
 0x293   :  { %1084 = vmax.xlane.f32.xlu0 %v1083_v59 }
 0x294   :  { %1081 = vmax.xlane.f32.xlu1 %v1080_v63 }
 0x297   :  { %1090 = vmax.xlane.f32.xlu0 %v1089_v36 }
 0x298   :  { %1087 = vmax.xlane.f32.xlu1 %v1086_v16 }
 0x29c   :  { %1093 = vmax.xlane.f32.xlu1 %v1092_v24 }
 0x2fc   :  { %v1278_v9 = vpop.xlane.xlu0 %1277 }
 0x2fd   :  { %3467 = vrcp.f32 %v1278_v9 }
 0x300   :  { %v1284_v15 = vpop.xlane.xlu0 %1283  ;;  %v1281_v51 = vpop.xlane.xlu1 %1280 }
 0x301   :  { %3469 = vrcp.f32 %v1281_v51 }
 0x302   :  { %3471 = vrcp.f32 %v1284_v15 }
 0x304   :  { %v1287_v59 = vpop.xlane.xlu1 %1286 }
 0x305   :  { %3473 = vrcp.f32 %v1287_v59 }
 0x30a   :  { %v3468_v10 = vpop.eup %3467 }
 0x30b   :  { %v1308_v32 = vmul.f32 %v3468_v10, %v4096_v55  ;;  %v4173_v10 = vld [vmem:[#allocation2 + $0x8] sm:$0xff]  }
 0x30c   :  { %v1290_v63 = vpop.xlane.xlu0 %1289 }
 0x30d   :  { %3475 = vrcp.f32 %v1290_v63 }
 0x30e   :  { %v3470_v44 = vpop.eup %3469 }
 0x30f   :  { %v3472_v36 = vpop.eup %3471  ;;  %v1309_v16 = vmul.f32 %v3470_v44, %v4102_v2 }
 0x310   :  { %v1296_v43 = vpop.xlane.xlu0 %1295  ;;  %v1310_v13 = vmul.f32 %v3472_v36, %v4100_v6 }
 0x311   :  { %v1293_v62 = vpop.xlane.xlu1 %1292  ;;  %v1316_v9 = vpack.c.bf16 %v1309_v16, %v1308_v32 }
 0x312   :  { %v3474_v24 = vpop.eup %3473  ;;  %3477 = vrcp.f32 %v1293_v62 }
 0x313   :  { %v1311_v51 = vmul.f32 %v3474_v24, %v4110_v56  ;;  %3479 = vrcp.f32 %v1296_v43  ;;  %3217 = vmatprep.mubr.msk.bf16.mxu0 %vm1070_vm0, %v1316_v9 }
 0x315   :  { %v1299_v15 = vpop.xlane.xlu1 %1298  ;;  %v1317_v59 = vpack.c.bf16 %v1311_v51, %v1310_v13 }
 0x316   :  { %3481 = vrcp.f32 %v1299_v15 }
 0x317   :  { %3218 = vmatmul.mubr.msk.bf16.vlgmr.msra.gmra.mxu0 %vm1070_vm0, %v1317_v59 }
 0x318   :  { %3242 = vmatpush3.bf16.xpose.msra.mxu0 %v3834_v50 }
 0x319   :  { %3243 = vmatprep.subr.bf16.mxu0 %v3828_v33 }
 0x31a   :  { %v3476_v55 = vpop.eup %3475 }
 0x31b   :  { %v1312_v32 = vmul.f32 %v3476_v55, %v4118_v19  ;;  %v4184_v19 = vld [vmem:[#allocation2] sm:$0xff]  }
 0x31f   :  { %v3478_v44 = vpop.eup %3477 }
 0x320   :  { %3244 = vmatpush3.bf16.xpose.msra.mxu0 %v3828_v33  ;;  %v1313_v62 = vmul.f32 %v3478_v44, %v4126_v31  ;;  %v3480_v43 = vpop.eup %3479  ;;  %v4967_v33 = vpack.c.bf16 %v3904_v23, %v3900_v18  ;;  %v4969_v31 = vpack.c.bf16 %v3924_v45, %v3920_v40  ;;  %v4970_v18 = vpack.c.bf16 %v3942_v57, %v3932_v52  ;;  %v1073_v45 = vpop.xlane.xlu0 %1072 }
 0x321   :  { %3245 = vmatprep.subr.bf16.mxu0 %v4173_v10  ;;  %v1314_v50 = vmul.f32 %v3480_v43, %v4124_v46  ;;  %v4968_v46 = vpack.c.bf16 %v3914_v34, %v3910_v28  ;;  %v1076_v52 = vpop.xlane.xlu1 %1075 }
 0x322   :  { %v1318_v13 = vpack.c.bf16 %v1313_v62, %v1312_v32  ;;  %v1096_v24 = vsub.f32 %v4128_v5, %v1076_v52 }
 0x323   :  { %v3482_v6 = vpop.eup %3481 }
 0x324   :  { %3221 = vmatprep.mubr.msk.bf16.mxu0 %vm1070_vm0, %v1318_v13  ;;  %v1315_v2 = vmul.f32 %v3482_v6, %v4136_v4 }
 0x326   :  { %v1319_v56 = vpack.c.bf16 %v1315_v2, %v1314_v50 }
 0x328   :  { %3222 = vmatmul.mubr.msk.bf16.gmra.mxu0 %vm1070_vm0, %v1319_v56 }
 0x329   :  { %3246 = vmatpush3.bf16.xpose.msra.mxu0 %v4173_v10  ;;  %3249 = vmatprep.mubr.bf16.mxu0 %v4967_v33 }
 0x32a   :  { %3247 = vmatprep.subr.bf16.mxu0 %v4184_v19 }
 0x331   :  { %3248 = vmatpush3.bf16.xpose.msra.mxu0 %v4184_v19 }
 0x332   :  { %3289 = vmatprep.subr.bf16.mxu0 %v4052_v27 }
 0x338   :  { %3250 = vmatmul.mubr.bf16.vlgmr.msra.gmra.mxu0 %v4968_v46 }
 0x339   :  { %3253 = vmatprep.mubr.bf16.mxu0 %v4969_v31  ;;  %3290 = vmatpush3.bf16.msra.mxu0 %v4052_v27 }
 0x33a   :  { %3291 = vmatprep.subr.bf16.mxu0 %v4046_v3 }
 0x33d   :  { %3292 = vmatpush3.bf16.msra.mxu0 %v4046_v3 }
 0x33e   :  { %3293 = vmatprep.subr.bf16.mxu0 %v4042_v0 }
 0x340   :  { %3254 = vmatmul.mubr.bf16.gmra.mxu0 %v4970_v18 }
 0x341   :  { %3294 = vmatpush3.bf16.msra.mxu0 %v4042_v0  ;;  %v1079_v0 = vpop.xlane.xlu0 %1078 }
 0x342   :  { %3295 = vmatprep.subr.bf16.mxu0 %v4038_v25  ;;  %v1097_v63 = vsub.f32 %v4112_v60, %v1079_v0 }
 0x344   :  { %v1107_v15 = vmul.f32 1.442695, %v1097_v63 }
 0x345   :  { %3296 = vmatpush3.bf16.msra.mxu0 %v4038_v25  ;;  %v1095_v25 = vsub.f32 %v4116_v39, %v1073_v45  ;;  %v1085_v4 = vpop.xlane.xlu0 %1084  ;;  %v1105_v39 = vmul.f32 1.442695, %v1096_v24 }
 0x346   :  { %3305 = vmatprep.subr.bf16.mxu0 %v3853_v11  ;;  %v1082_v11 = vpop.xlane.xlu1 %1081  ;;  %v1099_v51 = vsub.f32 %v4142_v29, %v1085_v4 }
 0x347   :  { %v1103_v16 = vmul.f32 1.442695, %v1095_v25  ;;  %v1098_v59 = vsub.f32 %v4120_v8, %v1082_v11 }
 0x348   :  { %v1111_v5 = vmul.f32 1.442695, %v1099_v51 }
 0x349   :  { %3483 = vpow2.f32 %v1103_v16  ;;  %v1091_v32 = vpop.xlane.xlu0 %1090  ;;  %v1109_v43 = vmul.f32 1.442695, %v1098_v59 }
 0x34a   :  { %v1088_v55 = vpop.xlane.xlu1 %1087  ;;  %3485 = vpow2.f32 %v1107_v15  ;;  %v1101_v29 = vsub.f32 %v4134_v47, %v1091_v32 }
 0x34b   :  { %3487 = vpow2.f32 %v1105_v39  ;;  %v1100_v8 = vsub.f32 %v4154_v22, %v1088_v55 }
 0x34c   :  { %3489 = vpow2.f32 %v1111_v5  ;;  %v1115_v33 = vmul.f32 1.442695, %v1101_v29 }
 0x34d   :  { %3491 = vpow2.f32 %v1109_v43  ;;  %v1113_v46 = vmul.f32 1.442695, %v1100_v8 }
 0x34e   :  { %v1094_v2 = vpop.xlane.xlu1 %1093  ;;  %3493 = vpow2.f32 %v1115_v33 }
 0x34f   :  { %v1102_v31 = vsub.f32 %v4148_v17, %v1094_v2  ;;  %3495 = vpow2.f32 %v1113_v46 }
 0x351   :  { %v1117_v0 = vmul.f32 1.442695, %v1102_v31 }
 0x353   :  { %3497 = vpow2.f32 %v1117_v0 }
 0x356   :  { %v4254_v4 = vpop.eup %3483 }
 0x357   :  { %v4256_v17 = vpop.eup %3485  ;;  %v1119_v63 = vsel %vm1070_vm0, %v4254_v4, 0.0 }
 0x358   :  { %v4262_v24 = vpop.eup %3487  ;;  %v1125_v59 = vsel %vm1070_vm0, %v4256_v17, 0.0 }
 0x359   :  { %v4264_v51 = vpop.eup %3489  ;;  %v1122_v55 = vsel %vm1070_vm0, %v4262_v24, 0.0 }
 0x35a   :  { %v4266_v15 = vpop.eup %3491  ;;  %v1131_v32 = vsel %vm1070_vm0, %v4264_v51, 0.0 }
 0x35b   :  { %v4272_v39 = vpop.eup %3493 }
 0x35c   :  { %v4278_v5 = vpop.eup %3495  ;;  %v1137_v43 = vsel %vm1070_vm0, %v4272_v39, 0.0 }
 0x35d   :  { %v1134_v29 = vsel %vm1070_vm0, %v4278_v5, 0.0 }
 0x360   :  { %v4284_v8 = vpop.eup %3497 }
 0x3d7   :  { %v4206_v23 = vpop.f32.mrf.mxu0 }
 0x3d9   :  { %v4208_v28 = vpop.f32.mrf.mxu0 }
 0x3db   :  { %v4210_v34 = vpop.f32.mrf.mxu0 }
 0x3dd   :  { %v4212_v40 = vpop.f32.mrf.mxu0 }
 0x3e8   :  { %v4214_v3 = vpop.f32.mrf.mxu0 }
 0x3ea   :  { %v4216_v57 = vpop.f32.mrf.mxu0 }
 0x3ec   :  { %v4218_v27 = vpop.f32.mrf.mxu0 }
 0x3ee   :  { %v4222_v36 = vpop.f32.mrf.mxu0 }
 0x3f8   :  { %v4225_v9 = vpop.f32.mrf.mxu0 }
 0x3f9   :  { %v1545_v6 = vsel %vm1070_vm0, %v4225_v9, -inf }
 0x3fa   :  { %v4229_v44 = vpop.f32.mrf.mxu0 }
 0x3fb   :  { %v1539_v60 = vsel %vm1070_vm0, %v4229_v44, -inf }
 0x3fc   :  { %1540 = vmax.xlane.f32.xlu0 %v1539_v60  ;;  %v4233_v62 = vpop.f32.mrf.mxu0  ;;  %v1128_v60 = vsel %vm1070_vm0, %v4266_v15, 0.0 }
 0x3fd   :  { %v1548_v18 = vsel %vm1070_vm0, %v4233_v62, -inf }
 0x3fe   :  { %v4236_v13 = vpop.f32.mrf.mxu0 }
 0x3ff   :  { %v1542_v50 = vsel %vm1070_vm0, %v4236_v13, -inf }
 0x400   :  { %1546 = vmax.xlane.f32.xlu0 %v1545_v6  ;;  %v4243_v56 = vpop.f32.mrf.mxu0  ;;  %1543 = vmax.xlane.f32.xlu1 %v1542_v50  ;;  %v1140_v6 = vsel %vm1070_vm0, %v4284_v8, 0.0 }
 0x401   :  { %v1557_v25 = vsel %vm1070_vm0, %v4243_v56, -inf }
 0x402   :  { %v1524_v47 = vpop.f32.mrf.mxu0 }
 0x403   :  { %v1551_v22 = vsel %vm1070_vm0, %v1524_v47, -inf }
 0x404   :  { %1552 = vmax.xlane.f32.xlu0 %v1551_v22  ;;  %v4249_v45 = vpop.f32.mrf.mxu0  ;;  %1549 = vmax.xlane.f32.xlu1 %v1548_v18 }
 0x405   :  { %v1560_v16 = vsel %vm1070_vm0, %v4249_v45, -inf }
 0x406   :  { %v1527_v52 = vpop.f32.mrf.mxu0 }
 0x407   :  { %v1554_v11 = vsel %vm1070_vm0, %v1527_v52, -inf }
 0x408   :  { %1558 = vmax.xlane.f32.xlu0 %v1557_v25  ;;  %1555 = vmax.xlane.f32.xlu1 %v1554_v11 }
 0x40c   :  { %1120 = vadd.xlane.f32.xlu0 %v1119_v63  ;;  %1561 = vmax.xlane.f32.xlu1 %v1560_v16 }
 0x410   :  { %1126 = vadd.xlane.f32.xlu0 %v1125_v59  ;;  %1123 = vadd.xlane.f32.xlu1 %v1122_v55 }
 0x414   :  { %1132 = vadd.xlane.f32.xlu0 %v1131_v32  ;;  %1129 = vadd.xlane.f32.xlu1 %v1128_v60 }
 0x418   :  { %1138 = vadd.xlane.f32.xlu0 %v1137_v43  ;;  %1135 = vadd.xlane.f32.xlu1 %v1134_v29 }
 0x41c   :  { %1141 = vadd.xlane.f32.xlu1 %v1140_v6 }
 0x485   :  { %v1541_v50 = vpop.xlane.xlu0 %1540 }
 0x486   :  { %v1563_v2 = vsub.f32 %v4229_v44, %v1541_v50 }
 0x488   :  { %v1571_v33 = vmul.f32 1.442695, %v1563_v2 }
 0x489   :  { %v1547_v46 = vpop.xlane.xlu0 %1546  ;;  %v1544_v31 = vpop.xlane.xlu1 %1543 }
 0x48a   :  { %3499 = vpow2.f32 %v1571_v33  ;;  %v1565_v22 = vsub.f32 %v4225_v9, %v1547_v46  ;;  %v1564_v18 = vsub.f32 %v4236_v13, %v1544_v31 }
 0x48c   :  { %v1575_v0 = vmul.f32 1.442695, %v1565_v22  ;;  %v1573_v25 = vmul.f32 1.442695, %v1564_v18 }
 0x48d   :  { %v1553_v11 = vpop.xlane.xlu0 %1552  ;;  %v1550_v63 = vpop.xlane.xlu1 %1549 }
 0x48e   :  { %3501 = vpow2.f32 %v1575_v0  ;;  %v1567_v16 = vsub.f32 %v1524_v47, %v1553_v11  ;;  %v1566_v59 = vsub.f32 %v4233_v62, %v1550_v63 }
 0x48f   :  { %3503 = vpow2.f32 %v1573_v25 }
 0x490   :  { %v1579_v55 = vmul.f32 1.442695, %v1567_v16  ;;  %v1577_v32 = vmul.f32 1.442695, %v1566_v59 }
 0x491   :  { %v1559_v44 = vpop.xlane.xlu0 %1558  ;;  %v1556_v60 = vpop.xlane.xlu1 %1555 }
 0x492   :  { %3505 = vpow2.f32 %v1579_v55  ;;  %v1569_v43 = vsub.f32 %v4243_v56, %v1559_v44  ;;  %v1568_v29 = vsub.f32 %v1527_v52, %v1556_v60 }
 0x493   :  { %3507 = vpow2.f32 %v1577_v32 }
 0x494   :  { %v1583_v9 = vmul.f32 1.442695, %v1569_v43  ;;  %v1581_v13 = vmul.f32 1.442695, %v1568_v29 }
 0x495   :  { %v1121_v6 = vpop.xlane.xlu0 %1120  ;;  %v1562_v50 = vpop.xlane.xlu1 %1561 }
 0x496   :  { %3509 = vpow2.f32 %v1583_v9  ;;  %v1570_v2 = vsub.f32 %v4249_v45, %v1562_v50 }
 0x497   :  { %v4294_v47 = vpop.eup %3499  ;;  %3511 = vpow2.f32 %v1581_v13 }
 0x498   :  { %v1585_v62 = vmul.f32 1.442695, %v1570_v2  ;;  %v1587_v33 = vsel %vm1070_vm0, %v4294_v47, 0.0  ;;  %3513 = vrcp.f32 %v1121_v6 }
 0x499   :  { %1588 = vadd.xlane.f32.xlu0 %v1587_v33  ;;  %v1127_v46 = vpop.xlane.xlu0 %1126  ;;  %v1124_v56 = vpop.xlane.xlu1 %1123 }
 0x49a   :  { %3515 = vpow2.f32 %v1585_v62 }
 0x49b   :  { %v4298_v52 = vpop.eup %3501  ;;  %3517 = vrcp.f32 %v1124_v56 }
 0x49c   :  { %v4300_v31 = vpop.eup %3503  ;;  %v1593_v45 = vsel %vm1070_vm0, %v4298_v52, 0.0  ;;  %3519 = vrcp.f32 %v1127_v46 }
 0x49d   :  { %1594 = vadd.xlane.f32.xlu0 %v1593_v45  ;;  %v1133_v22 = vpop.xlane.xlu0 %1132  ;;  %v1590_v18 = vsel %vm1070_vm0, %v4300_v31, 0.0  ;;  %v1130_v0 = vpop.xlane.xlu1 %1129 }
 0x49e   :  { %1591 = vadd.xlane.f32.xlu1 %v1590_v18  ;;  %3521 = vrcp.f32 %v1130_v0 }
 0x49f   :  { %v4306_v25 = vpop.eup %3505  ;;  %3523 = vrcp.f32 %v1133_v22 }
 0x4a0   :  { %v4308_v11 = vpop.eup %3507  ;;  %v1599_v63 = vsel %vm1070_vm0, %v4306_v25, 0.0 }
 0x4a1   :  { %1600 = vadd.xlane.f32.xlu0 %v1599_v63  ;;  %v1139_v16 = vpop.xlane.xlu0 %1138  ;;  %v1596_v59 = vsel %vm1070_vm0, %v4308_v11, 0.0  ;;  %v1136_v55 = vpop.xlane.xlu1 %1135 }
 0x4a2   :  { %1597 = vadd.xlane.f32.xlu1 %v1596_v59  ;;  %3525 = vrcp.f32 %v1136_v55 }
 0x4a3   :  { %v4314_v32 = vpop.eup %3509  ;;  %3527 = vrcp.f32 %v1139_v16 }
 0x4a4   :  { %v4316_v44 = vpop.eup %3511  ;;  %v1605_v60 = vsel %vm1070_vm0, %v4314_v32, 0.0 }
 0x4a5   :  { %1606 = vadd.xlane.f32.xlu0 %v1605_v60  ;;  %v1602_v43 = vsel %vm1070_vm0, %v4316_v44, 0.0  ;;  %v1142_v29 = vpop.xlane.xlu1 %1141  ;;  %v3514_v9 = vpop.eup %3513 }
 0x4a6   :  { %1603 = vadd.xlane.f32.xlu1 %v1602_v43  ;;  %3529 = vrcp.f32 %v1142_v29  ;;  %v1151_v62 = vmul.f32 %v3514_v9, %v4254_v4 }
 0x4a7   :  { %v4322_v13 = vpop.eup %3515 }
 0x4a8   :  { %v1608_v6 = vsel %vm1070_vm0, %v4322_v13, 0.0  ;;  %v3518_v50 = vpop.eup %3517 }
 0x4a9   :  { %v3520_v2 = vpop.eup %3519  ;;  %v1152_v33 = vmul.f32 %v3518_v50, %v4262_v24 }
 0x4aa   :  { %1609 = vadd.xlane.f32.xlu1 %v1608_v6  ;;  %v1153_v45 = vmul.f32 %v3520_v2, %v4256_v17 }
 0x4ab   :  { %v3522_v46 = vpop.eup %3521  ;;  %v1159_v56 = vpack.c.bf16 %v1152_v33, %v1151_v62 }
 0x4ac   :  { %v1154_v22 = vmul.f32 %v3522_v46, %v4266_v15  ;;  %v3524_v18 = vpop.eup %3523 }
 0x4ad   :  { %3233 = vmatprep.mubr.msk.bf16.mxu1 %vm1070_vm0, %v1159_v56  ;;  %v1155_v59 = vmul.f32 %v3524_v18, %v4264_v51 }
 0x4ae   :  { %v1160_v0 = vpack.c.bf16 %v1154_v22, %v1153_v45 }
 0x4af   :  { %v3526_v63 = vpop.eup %3525 }
 0x4b0   :  { %v3528_v16 = vpop.eup %3527  ;;  %3234 = vmatmul.mubr.msk.bf16.vlgmr.msra.gmra.mxu1 %vm1070_vm0, %v1160_v0  ;;  %v1156_v4 = vmul.f32 %v3526_v63, %v4278_v5 }
 0x4b1   :  { %3258 = vmatpush3.bf16.msra.mxu1 %v4054_v12  ;;  %v1157_v15 = vmul.f32 %v3528_v16, %v4272_v39  ;;  %v3709_v12 = vld [vmem:[#allocation2 + $0x18] sm:$0xff]   ;;  %v3710_v16 = vld [vmem:[#allocation2 + $0x10] sm:$0xff]  }
 0x4b2   :  { %3259 = vmatprep.subr.bf16.mxu1 %v4044_v48  ;;  %v1161_v17 = vpack.c.bf16 %v1156_v4, %v1155_v59 }
 0x4b3   :  { %v3530_v24 = vpop.eup %3529 }
 0x4b4   :  { %v1158_v55 = vmul.f32 %v3530_v24, %v4284_v8  ;;  %3237 = vmatprep.mubr.msk.bf16.mxu1 %vm1070_vm0, %v1161_v17  ;;  %v944_v24 = vpack.c.bf16 %v3908_v26, %v3902_v20  ;;  %v960_v20 = vpack.c.bf16 %v3928_v49, %v3922_v42  ;;  %v4371_v26 = vld [vmem:[#allocation2 + $0x30] sm:$0xff]   ;;  %v4384_v42 = vld [vmem:[#allocation2 + $0x20] sm:$0xff]   ;;  %v4972_v49 = vpack.c.bf16 %v3966_v7, %v3956_v1 }
 0x4b5   :  { %3260 = vmatpush3.bf16.msra.mxu1 %v4044_v48  ;;  %v4979_v1 = vld [vmem:[#allocation37_spill] sm:$0xff]  ;;  %v4980_v7 = vld [vmem:[#allocation51_spill] sm:$0xff] }
 0x4b6   :  { %v1162_v60 = vpack.c.bf16 %v1158_v55, %v1157_v15  ;;  %3261 = vmatprep.subr.bf16.mxu1 %v4040_v41 }
 0x4b8   :  { %3238 = vmatmul.mubr.msk.bf16.gmra.mxu1 %vm1070_vm0, %v1162_v60 }
 0x4b9   :  { %3262 = vmatpush3.bf16.msra.mxu1 %v4040_v41 }
 0x4ba   :  { %3263 = vmatprep.subr.bf16.mxu1 %v4036_v35 }
 0x4bd   :  { %3264 = vmatpush3.bf16.msra.mxu1 %v4036_v35 }
 0x4be   :  { %3273 = vmatprep.subr.bf16.mxu1 %v3709_v12 }
 0x522   :  { %v1589_v51 = vpop.xlane.xlu0 %1588 }
 0x523   :  { %3531 = vrcp.f32 %v1589_v51 }
 0x526   :  { %v1595_v39 = vpop.xlane.xlu0 %1594 }
 0x527   :  { %v1592_v5 = vpop.xlane.xlu1 %1591 }
 0x528   :  { %3533 = vrcp.f32 %v1592_v5 }
 0x529   :  { %3535 = vrcp.f32 %v1595_v39 }
 0x52a   :  { %v1601_v48 = vpop.xlane.xlu0 %1600 }
 0x52b   :  { %v1598_v8 = vpop.xlane.xlu1 %1597 }
 0x52c   :  { %3537 = vrcp.f32 %v1598_v8 }
 0x52d   :  { %3539 = vrcp.f32 %v1601_v48 }
 0x52e   :  { %v1607_v43 = vpop.xlane.xlu0 %1606 }
 0x52f   :  { %v1604_v29 = vpop.xlane.xlu1 %1603 }
 0x530   :  { %3541 = vrcp.f32 %v1604_v29  ;;  %v3532_v41 = vpop.eup %3531 }
 0x531   :  { %3543 = vrcp.f32 %v1607_v43  ;;  %v1619_v6 = vmul.f32 %v3532_v41, %v4294_v47 }
 0x533   :  { %v1610_v9 = vpop.xlane.xlu1 %1609 }
 0x534   :  { %3545 = vrcp.f32 %v1610_v9 }
 0x535   :  { %v3534_v35 = vpop.eup %3533 }
 0x536   :  { %v1620_v50 = vmul.f32 %v3534_v35, %v4300_v31  ;;  %v3536_v2 = vpop.eup %3535 }
 0x537   :  { %v1621_v46 = vmul.f32 %v3536_v2, %v4298_v52 }
 0x538   :  { %v1627_v62 = vpack.c.bf16 %v1620_v50, %v1619_v6 }
 0x539   :  { %v3538_v33 = vpop.eup %3537 }
 0x53a   :  { %v1622_v56 = vmul.f32 %v3538_v33, %v4308_v11  ;;  %3265 = vmatprep.mubr.msk.bf16.mxu1 %vm1070_vm0, %v1627_v62  ;;  %v3540_v45 = vpop.eup %3539 }
 0x53b   :  { %v1623_v0 = vmul.f32 %v3540_v45, %v4306_v25  ;;  %v4363_v25 = vld [vmem:[#allocation2 + $0x38] sm:$0xff]  }
 0x53c   :  { %v1628_v22 = vpack.c.bf16 %v1622_v56, %v1621_v46 }
 0x53d   :  { %v3542_v18 = vpop.eup %3541 }
 0x53e   :  { %3266 = vmatmul.mubr.msk.bf16.vlgmr.msra.gmra.mxu1 %vm1070_vm0, %v1628_v22  ;;  %v1624_v47 = vmul.f32 %v3542_v18, %v4316_v44  ;;  %v3544_v63 = vpop.eup %3543 }
 0x53f   :  { %3274 = vmatpush3.bf16.xpose.msra.mxu1 %v3709_v12  ;;  %v1625_v52 = vmul.f32 %v3544_v63, %v4314_v32  ;;  %v952_v32 = vpack.c.bf16 %v3918_v38, %v3912_v30  ;;  %v4971_v30 = vpack.c.bf16 %v3944_v58, %v3934_v53  ;;  %v4380_v38 = vld [vmem:[#allocation2 + $0x28] sm:$0xff]   ;;  %v4973_v53 = vpack.c.bf16 %v3990_v21, %v3980_v14  ;;  %v4975_v58 = vld [vmem:[#allocation39_spill] sm:$0xff] }
 0x540   :  { %v1629_v31 = vpack.c.bf16 %v1624_v47, %v1623_v0  ;;  %3275 = vmatprep.subr.bf16.mxu1 %v3710_v16 }
 0x541   :  { %v3546_v59 = vpop.eup %3545 }
 0x542   :  { %3269 = vmatprep.mubr.msk.bf16.mxu1 %vm1070_vm0, %v1629_v31  ;;  %v1626_v11 = vmul.f32 %v3546_v59, %v4322_v13 }
 0x544   :  { %v1630_v4 = vpack.c.bf16 %v1626_v11, %v1625_v52 }
 0x546   :  { %3270 = vmatmul.mubr.msk.bf16.gmra.mxu1 %vm1070_vm0, %v1630_v4 }
 0x547   :  { %3276 = vmatpush3.bf16.xpose.msra.mxu1 %v3710_v16  ;;  %3281 = vmatprep.mubr.bf16.mxu1 %v944_v24 }
 0x548   :  { %3277 = vmatprep.subr.bf16.mxu1 %v4173_v10 }
 0x54f   :  { %3278 = vmatpush3.bf16.xpose.msra.mxu1 %v4173_v10  ;;  %v968_v10 = vpack.c.bf16 %v3950_v61, %v3936_v54  ;;  %v4974_v54 = vld [vmem:[#allocation43_spill] sm:$0xff] }
 0x550   :  { %3279 = vmatprep.subr.bf16.mxu1 %v4184_v19  ;;  %v4976_v61 = vld [vmem:[#allocation31_spill] sm:$0xff] }
 0x557   :  { %3280 = vmatpush3.bf16.xpose.msra.mxu1 %v4184_v19  ;;  %v4977_v19 = vld [vmem:[#allocation27_spill] sm:$0xff] }
 0x558   :  { %3321 = vmatprep.subr.bf16.mxu1 %v4363_v25  ;;  %v4978_v44 = vpack.c.bf16 %v4976_v61, %v4977_v19 }
 0x55e   :  { %3282 = vmatmul.mubr.bf16.vlgmr.msra.gmra.mxu1 %v952_v32 }
 0x55f   :  { %3285 = vmatprep.mubr.bf16.mxu1 %v960_v20  ;;  %3322 = vmatpush3.bf16.xpose.msra.mxu1 %v4363_v25 }
 0x560   :  { %3323 = vmatprep.subr.bf16.mxu1 %v4371_v26 }
 0x566   :  { %3286 = vmatmul.mubr.bf16.gmra.mxu1 %v968_v10 }
 0x567   :  { %3324 = vmatpush3.bf16.xpose.msra.mxu1 %v4371_v26  ;;  %3329 = vmatprep.mubr.bf16.mxu1 %v4971_v30 }
 0x568   :  { %3325 = vmatprep.subr.bf16.mxu1 %v4380_v38 }
 0x56f   :  { %3326 = vmatpush3.bf16.xpose.msra.mxu1 %v4380_v38 }
 0x570   :  { %3327 = vmatprep.subr.bf16.mxu1 %v4384_v42  ;;  %v3235_v14 = vpop.f32.mrf.mxu1 }
 0x571   :  { %v1452_v12 = vadd.f32 %v3235_v14, %v4206_v23 }
 0x572   :  { %v1443_v21 = vpop.f32.mrf.mxu1 }
 0x573   :  { %v1444_v39 = vadd.f32 %v1443_v21, %v4208_v28 }
 0x577   :  { %3328 = vmatpush3.bf16.xpose.msra.mxu1 %v4384_v42 }
 0x578   :  { %3353 = vmatprep.subr.bf16.mxu1 %v4076_v37 }
 0x57e   :  { %3330 = vmatmul.mubr.bf16.vlgmr.msra.gmra.mxu1 %v4972_v49 }
 0x57f   :  { %3333 = vmatprep.mubr.bf16.mxu1 %v4973_v53  ;;  %3354 = vmatpush3.bf16.msra.mxu1 %v4076_v37  ;;  %v3236_v37 = vpop.f32.mrf.mxu1 }
 0x580   :  { %3355 = vmatprep.subr.bf16.mxu1 %v4974_v54  ;;  %v1455_v8 = vadd.f32 %v3236_v37, %v4210_v34 }
 0x581   :  { %v1446_v13 = vpop.f32.mrf.mxu1 }
 0x582   :  { %v1447_v41 = vadd.f32 %v1446_v13, %v4212_v40 }
 0x583   :  { %3356 = vmatpush3.bf16.msra.mxu1 %v4974_v54  ;;  %v3239_v17 = vpop.f32.mrf.mxu1 }
 0x584   :  { %3357 = vmatprep.subr.bf16.mxu1 %v4975_v58  ;;  %v1468_v6 = vadd.f32 %v3239_v17, %v4214_v3 }
 0x585   :  { %v1459_v15 = vpop.f32.mrf.mxu1 }
 0x586   :  { %3334 = vmatmul.mubr.bf16.gmra.mxu1 %v4978_v44  ;;  %v1460_v28 = vadd.f32 %v1459_v15, %v4216_v57 }
 0x587   :  { %3358 = vmatpush3.bf16.msra.mxu1 %v4975_v58  ;;  %v3240_v55 = vpop.f32.mrf.mxu1 }
 0x588   :  { %3359 = vmatprep.subr.bf16.mxu1 %v4979_v1  ;;  %v1471_v34 = vadd.f32 %v3240_v55, %v4218_v27 }
 0x589   :  { %v4406_v60 = vpop.f32.mrf.mxu1 }
 0x58b   :  { %3360 = vmatpush3.bf16.msra.mxu1 %v4979_v1 }
 0x58c   :  { %3385 = vmatprep.subr.bf16.mxu1 %v4980_v7 }
 0x5fe   :  { %v3267_v51 = vpop.f32.mrf.mxu1 }
 0x5ff   :  { %v4410_v5 = vadd.f32 %v3267_v51, %v1452_v12 }
 0x600   :  { %v1677_v48 = vpop.f32.mrf.mxu1 }
 0x601   :  { %v4413_v43 = vadd.f32 %v1677_v48, %v1444_v39 }
 0x602   :  { %v3268_v29 = vpop.f32.mrf.mxu1 }
 0x603   :  { %v4416_v9 = vadd.f32 %v3268_v29, %v1455_v8 }
 0x604   :  { %v1680_v35 = vpop.f32.mrf.mxu1 }
 0x605   :  { %v4419_v50 = vadd.f32 %v1680_v35, %v1447_v41 }
 0x606   :  { %v3271_v23 = vpop.f32.mrf.mxu1 }
 0x607   :  { %v4422_v2 = vadd.f32 %v3271_v23, %v1468_v6 }
 0x608   :  { %v1693_v62 = vpop.f32.mrf.mxu1 }
 0x609   :  { %v4425_v33 = vadd.f32 %v1693_v62, %v1460_v28 }
 0x60a   :  { %v3272_v46 = vpop.f32.mrf.mxu1 }
 0x60b   :  { %v4427_v56 = vadd.f32 %v3272_v46, %v1471_v34 }
 0x60c   :  { %v4429_v40 = vpop.f32.mrf.mxu1 }
 0x61e   :  { %v3283_v45 = vpop.f32.mrf.mxu1 }
 0x61f   :  { %v1787_v57 = vsel %vm1070_vm0, %v3283_v45, -inf }
 0x620   :  { %v1750_v22 = vpop.f32.mrf.mxu1 }
 0x621   :  { %v1781_v3 = vsel %vm1070_vm0, %v1750_v22, -inf }
 0x622   :  { %1782 = vmax.xlane.f32.xlu0 %v1781_v3  ;;  %v3284_v18 = vpop.f32.mrf.mxu1 }
 0x623   :  { %v1790_v31 = vsel %vm1070_vm0, %v3284_v18, -inf }
 0x624   :  { %v1753_v0 = vpop.f32.mrf.mxu1 }
 0x625   :  { %v1784_v47 = vsel %vm1070_vm0, %v1753_v0, -inf }
 0x626   :  { %1788 = vmax.xlane.f32.xlu0 %v1787_v57  ;;  %1785 = vmax.xlane.f32.xlu1 %v1784_v47  ;;  %v3287_v27 = vpop.f32.mrf.mxu1 }
 0x627   :  { %v1799_v11 = vsel %vm1070_vm0, %v3287_v27, -inf }
 0x628   :  { %v1766_v63 = vpop.f32.mrf.mxu1 }
 0x629   :  { %v1793_v16 = vsel %vm1070_vm0, %v1766_v63, -inf }
 0x62a   :  { %1791 = vmax.xlane.f32.xlu1 %v1790_v31  ;;  %1794 = vmax.xlane.f32.xlu0 %v1793_v16  ;;  %v4436_v59 = vpop.f32.mrf.mxu1 }
 0x62b   :  { %v1802_v24 = vsel %vm1070_vm0, %v4436_v59, -inf }
 0x62c   :  { %v1769_v52 = vpop.f32.mrf.mxu1 }
 0x62d   :  { %v1796_v4 = vsel %vm1070_vm0, %v1769_v52, -inf }
 0x62e   :  { %1800 = vmax.xlane.f32.xlu0 %v1799_v11  ;;  %1797 = vmax.xlane.f32.xlu1 %v1796_v4 }
 0x632   :  { %1803 = vmax.xlane.f32.xlu1 %v1802_v24 }
 0x63e   :  { %v4442_v32 = vpop.f32.mrf.mxu1 }
 0x63f   :  { %v2194_v53 = vsel %vm1070_vm0, %v4442_v32, -inf }
 0x640   :  { %v4444_v20 = vpop.f32.mrf.mxu1 }
 0x641   :  { %v2188_v10 = vsel %vm1070_vm0, %v4444_v20, -inf }
 0x642   :  { %2189 = vmax.xlane.f32.xlu0 %v2188_v10  ;;  %v4448_v30 = vpop.f32.mrf.mxu1 }
 0x643   :  { %v2197_v44 = vsel %vm1070_vm0, %v4448_v30, -inf }
 0x644   :  { %v4450_v49 = vpop.f32.mrf.mxu1 }
 0x645   :  { %v2191_v54 = vsel %vm1070_vm0, %v4450_v49, -inf }
 0x646   :  { %2195 = vmax.xlane.f32.xlu0 %v2194_v53  ;;  %v4456_v58 = vpop.f32.mrf.mxu1  ;;  %2192 = vmax.xlane.f32.xlu1 %v2191_v54 }
 0x647   :  { %v2206_v21 = vsel %vm1070_vm0, %v4456_v58, -inf }
 0x648   :  { %v4458_v61 = vpop.f32.mrf.mxu1 }
 0x649   :  { %v2200_v19 = vsel %vm1070_vm0, %v4458_v61, -inf }
 0x64a   :  { %2201 = vmax.xlane.f32.xlu0 %v2200_v19  ;;  %v4464_v1 = vpop.f32.mrf.mxu1  ;;  %2198 = vmax.xlane.f32.xlu1 %v2197_v44 }
 0x64b   :  { %v2209_v13 = vsel %vm1070_vm0, %v4464_v1, -inf }
 0x64c   :  { %v4466_v14 = vpop.f32.mrf.mxu1 }
 0x64d   :  { %v2203_v37 = vsel %vm1070_vm0, %v4466_v14, -inf }
 0x64e   :  { %2207 = vmax.xlane.f32.xlu0 %v2206_v21  ;;  %2204 = vmax.xlane.f32.xlu1 %v2203_v37 }
 0x652   :  { %2210 = vmax.xlane.f32.xlu1 %v2209_v13 }
 0x6ab   :  { %v1783_v17 = vpop.xlane.xlu0 %1782 }
 0x6ac   :  { %v1805_v15 = vsub.f32 %v1750_v22, %v1783_v17 }
 0x6ae   :  { %v1813_v55 = vmul.f32 1.442695, %v1805_v15 }
 0x6af   :  { %v1789_v12 = vpop.xlane.xlu0 %1788  ;;  %v1786_v51 = vpop.xlane.xlu1 %1785 }
 0x6b0   :  { %3547 = vpow2.f32 %v1813_v55  ;;  %v1807_v39 = vsub.f32 %v3283_v45, %v1789_v12  ;;  %v1806_v48 = vsub.f32 %v1753_v0, %v1786_v51 }
 0x6b2   :  { %v1817_v8 = vmul.f32 1.442695, %v1807_v39  ;;  %v1815_v29 = vmul.f32 1.442695, %v1806_v48 }
 0x6b3   :  { %v1792_v41 = vpop.xlane.xlu1 %1791  ;;  %v1795_v35 = vpop.xlane.xlu0 %1794 }
 0x6b4   :  { %3549 = vpow2.f32 %v1817_v8  ;;  %v1808_v6 = vsub.f32 %v3284_v18, %v1792_v41  ;;  %v1809_v23 = vsub.f32 %v1766_v63, %v1795_v35 }
 0x6b5   :  { %3551 = vpow2.f32 %v1815_v29 }
 0x6b6   :  { %v1819_v28 = vmul.f32 1.442695, %v1808_v6  ;;  %v1821_v62 = vmul.f32 1.442695, %v1809_v23 }
 0x6b7   :  { %v1801_v34 = vpop.xlane.xlu0 %1800  ;;  %v1798_v46 = vpop.xlane.xlu1 %1797 }
 0x6b8   :  { %3553 = vpow2.f32 %v1819_v28  ;;  %v1811_v22 = vsub.f32 %v3287_v27, %v1801_v34  ;;  %v1810_v3 = vsub.f32 %v1769_v52, %v1798_v46 }
 0x6b9   :  { %3555 = vpow2.f32 %v1821_v62 }
 0x6ba   :  { %v1825_v57 = vmul.f32 1.442695, %v1811_v22  ;;  %v1823_v47 = vmul.f32 1.442695, %v1810_v3 }
 0x6bb   :  { %v1804_v45 = vpop.xlane.xlu1 %1803 }
 0x6bc   :  { %3557 = vpow2.f32 %v1825_v57  ;;  %v1812_v0 = vsub.f32 %v4436_v59, %v1804_v45 }
 0x6bd   :  { %v4475_v31 = vpop.eup %3547  ;;  %3559 = vpow2.f32 %v1823_v47 }
 0x6be   :  { %v1827_v18 = vmul.f32 1.442695, %v1812_v0  ;;  %v1829_v63 = vsel %vm1070_vm0, %v4475_v31, 0.0 }
 0x6bf   :  { %1830 = vadd.xlane.f32.xlu0 %v1829_v63 }
 0x6c0   :  { %3561 = vpow2.f32 %v1827_v18 }
 0x6c1   :  { %v4479_v16 = vpop.eup %3549 }
 0x6c2   :  { %v4481_v27 = vpop.eup %3551  ;;  %v1835_v52 = vsel %vm1070_vm0, %v4479_v16, 0.0 }
 0x6c3   :  { %1836 = vadd.xlane.f32.xlu0 %v1835_v52  ;;  %v1832_v59 = vsel %vm1070_vm0, %v4481_v27, 0.0 }
 0x6c4   :  { %1833 = vadd.xlane.f32.xlu1 %v1832_v59 }
 0x6c5   :  { %v4487_v11 = vpop.eup %3553 }
 0x6c6   :  { %v4489_v4 = vpop.eup %3555  ;;  %v1838_v24 = vsel %vm1070_vm0, %v4487_v11, 0.0 }
 0x6c7   :  { %v1841_v10 = vsel %vm1070_vm0, %v4489_v4, 0.0 }
 0x6c8   :  { %1842 = vadd.xlane.f32.xlu0 %v1841_v10  ;;  %1839 = vadd.xlane.f32.xlu1 %v1838_v24 }
 0x6c9   :  { %v4495_v53 = vpop.eup %3557 }
 0x6ca   :  { %v4497_v54 = vpop.eup %3559  ;;  %v1847_v19 = vsel %vm1070_vm0, %v4495_v53, 0.0 }
 0x6cb   :  { %v2190_v44 = vpop.xlane.xlu0 %2189  ;;  %v1844_v21 = vsel %vm1070_vm0, %v4497_v54, 0.0 }
 0x6cc   :  { %v2212_v37 = vsub.f32 %v4444_v20, %v2190_v44  ;;  %1848 = vadd.xlane.f32.xlu0 %v1847_v19  ;;  %1845 = vadd.xlane.f32.xlu1 %v1844_v21 }
 0x6cd   :  { %v4504_v13 = vpop.eup %3561 }
 0x6ce   :  { %v2220_v17 = vmul.f32 1.442695, %v2212_v37  ;;  %v1850_v15 = vsel %vm1070_vm0, %v4504_v13, 0.0 }
 0x6cf   :  { %v2196_v55 = vpop.xlane.xlu0 %2195  ;;  %v2193_v12 = vpop.xlane.xlu1 %2192 }
 0x6d0   :  { %3563 = vpow2.f32 %v2220_v17  ;;  %v2214_v51 = vsub.f32 %v4442_v32, %v2196_v55  ;;  %1851 = vadd.xlane.f32.xlu1 %v1850_v15  ;;  %v2213_v39 = vsub.f32 %v4450_v49, %v2193_v12 }
 0x6d2   :  { %v2224_v48 = vmul.f32 1.442695, %v2214_v51  ;;  %v2222_v8 = vmul.f32 1.442695, %v2213_v39 }
 0x6d3   :  { %v2202_v29 = vpop.xlane.xlu0 %2201  ;;  %v2199_v20 = vpop.xlane.xlu1 %2198 }
 0x6d4   :  { %3565 = vpow2.f32 %v2224_v48  ;;  %v2216_v41 = vsub.f32 %v4458_v61, %v2202_v29  ;;  %v2215_v35 = vsub.f32 %v4448_v30, %v2199_v20 }
 0x6d5   :  { %3567 = vpow2.f32 %v2222_v8 }
 0x6d6   :  { %v2228_v6 = vmul.f32 1.442695, %v2216_v41  ;;  %v2226_v23 = vmul.f32 1.442695, %v2215_v35 }
 0x6d7   :  { %v2208_v28 = vpop.xlane.xlu0 %2207  ;;  %v2205_v62 = vpop.xlane.xlu1 %2204 }
 0x6d8   :  { %3569 = vpow2.f32 %v2228_v6  ;;  %v2218_v32 = vsub.f32 %v4456_v58, %v2208_v28  ;;  %v2217_v34 = vsub.f32 %v4466_v14, %v2205_v62 }
 0x6d9   :  { %3571 = vpow2.f32 %v2226_v23 }
 0x6da   :  { %v2232_v49 = vmul.f32 1.442695, %v2218_v32  ;;  %v2230_v46 = vmul.f32 1.442695, %v2217_v34 }
 0x6db   :  { %v2211_v22 = vpop.xlane.xlu1 %2210 }
 0x6dc   :  { %3573 = vpow2.f32 %v2232_v49  ;;  %v2219_v3 = vsub.f32 %v4464_v1, %v2211_v22 }
 0x6dd   :  { %v4515_v61 = vpop.eup %3563  ;;  %3575 = vpow2.f32 %v2230_v46 }
 0x6de   :  { %v2234_v30 = vmul.f32 1.442695, %v2219_v3  ;;  %v2236_v57 = vsel %vm1070_vm0, %v4515_v61, 0.0 }
 0x6df   :  { %2237 = vadd.xlane.f32.xlu0 %v2236_v57 }
 0x6e0   :  { %3577 = vpow2.f32 %v2234_v30  ;;  %v4982_v30 = vld [vmem:[#allocation11_spill] sm:$0xff] }
 0x6e1   :  { %v4519_v47 = vpop.eup %3565 }
 0x6e2   :  { %v4521_v58 = vpop.eup %3567  ;;  %v2242_v14 = vsel %vm1070_vm0, %v4519_v47, 0.0 }
 0x6e3   :  { %2243 = vadd.xlane.f32.xlu0 %v2242_v14  ;;  %v2239_v1 = vsel %vm1070_vm0, %v4521_v58, 0.0 }
 0x6e4   :  { %2240 = vadd.xlane.f32.xlu1 %v2239_v1  ;;  %v4984_v1 = vld [vmem:[#allocation47_spill] sm:$0xff] }
 0x6e5   :  { %v4527_v45 = vpop.eup %3569 }
 0x6e6   :  { %v4529_v0 = vpop.eup %3571  ;;  %v2248_v18 = vsel %vm1070_vm0, %v4527_v45, 0.0 }
 0x6e7   :  { %2249 = vadd.xlane.f32.xlu0 %v2248_v18  ;;  %v2245_v63 = vsel %vm1070_vm0, %v4529_v0, 0.0  ;;  %v4985_v18 = vld [vmem:[#allocation53_spill] sm:$0xff] }
 0x6e8   :  { %2246 = vadd.xlane.f32.xlu1 %v2245_v63  ;;  %v1002_v63 = vpack.c.bf16 %v4985_v18, %v4984_v1  ;;  %v5009_v1 = vld [vmem:[#allocation49_spill] sm:$0xff]  ;;  %v5011_v18 = vld [vmem:[#allocation35_spill] sm:$0xff] }
 0x6e9   :  { %v4535_v52 = vpop.eup %3573 }
 0x6ea   :  { %v4537_v59 = vpop.eup %3575  ;;  %v2254_v24 = vsel %vm1070_vm0, %v4535_v52, 0.0 }
 0x6eb   :  { %2255 = vadd.xlane.f32.xlu0 %v2254_v24  ;;  %v2251_v10 = vsel %vm1070_vm0, %v4537_v59, 0.0 }
 0x6ec   :  { %2252 = vadd.xlane.f32.xlu1 %v2251_v10 }
 0x6ed   :  { %v4543_v19 = vpop.eup %3577 }
 0x6ee   :  { %v2257_v44 = vsel %vm1070_vm0, %v4543_v19, 0.0 }
 0x6f0   :  { %2258 = vadd.xlane.f32.xlu1 %v2257_v44 }
 0x748   :  { %v1831_v21 = vpop.xlane.xlu0 %1830 }
 0x749   :  { %3579 = vrcp.f32 %v1831_v21 }
 0x74c   :  { %v1837_v37 = vpop.xlane.xlu0 %1836 }
 0x74d   :  { %v1834_v17 = vpop.xlane.xlu1 %1833 }
 0x74e   :  { %3581 = vrcp.f32 %v1834_v17  ;;  %v4987_v17 = vld [vmem:[#allocation13_spill] sm:$0xff] }
 0x74f   :  { %3583 = vrcp.f32 %v1837_v37  ;;  %v4986_v37 = vld [vmem:[#allocation16_spill] sm:$0xff] }
 0x751   :  { %v1843_v15 = vpop.xlane.xlu0 %1842  ;;  %v1840_v55 = vpop.xlane.xlu1 %1839 }
 0x752   :  { %3585 = vrcp.f32 %v1840_v55 }
 0x753   :  { %3587 = vrcp.f32 %v1843_v15  ;;  %v4988_v15 = vpack.c.bf16 %v4986_v37, %v4987_v17 }
 0x755   :  { %v1849_v12 = vpop.xlane.xlu0 %1848  ;;  %v1846_v51 = vpop.xlane.xlu1 %1845 }
 0x756   :  { %3589 = vrcp.f32 %v1846_v51  ;;  %v3580_v39 = vpop.eup %3579  ;;  %v4990_v51 = vld [vmem:[#allocation19_spill] sm:$0xff] }
 0x757   :  { %3591 = vrcp.f32 %v1849_v12  ;;  %v1861_v29 = vmul.f32 %v3580_v39, %v4475_v31  ;;  %v4989_v12 = vld [vmem:[#allocation22_spill] sm:$0xff] }
 0x758   :  { %v4991_v39 = vpack.c.bf16 %v4989_v12, %v4990_v51 }
 0x759   :  { %v1852_v48 = vpop.xlane.xlu1 %1851 }
 0x75a   :  { %3593 = vrcp.f32 %v1852_v48 }
 0x75b   :  { %v3582_v8 = vpop.eup %3581 }
 0x75c   :  { %v1862_v20 = vmul.f32 %v3582_v8, %v4481_v27  ;;  %v3584_v41 = vpop.eup %3583  ;;  %v4992_v8 = vld [vmem:[#allocation45_spill] sm:$0xff] }
 0x75d   :  { %v1863_v23 = vmul.f32 %v3584_v41, %v4479_v16  ;;  %v4993_v41 = vld [vmem:[#allocation41_spill] sm:$0xff] }
 0x75e   :  { %v1869_v35 = vpack.c.bf16 %v1862_v20, %v1861_v29 }
 0x75f   :  { %v3586_v6 = vpop.eup %3585 }
 0x760   :  { %3297 = vmatprep.mubr.msk.bf16.mxu0 %vm1070_vm0, %v1869_v35  ;;  %v1864_v28 = vmul.f32 %v3586_v6, %v4487_v11  ;;  %v3588_v62 = vpop.eup %3587 }
 0x761   :  { %v1865_v46 = vmul.f32 %v3588_v62, %v4489_v4  ;;  %v4981_v4 = vld [vmem:[#allocation12_spill] sm:$0xff]  ;;  %v4995_v62 = vld [vmem:[#allocation25_spill] sm:$0xff] }
 0x762   :  { %v1870_v32 = vpack.c.bf16 %v1864_v28, %v1863_v23  ;;  %v4994_v28 = vld [vmem:[#allocation29_spill] sm:$0xff] }
 0x763   :  { %v3590_v34 = vpop.eup %3589 }
 0x764   :  { %v3592_v49 = vpop.eup %3591  ;;  %3298 = vmatmul.mubr.msk.bf16.vlgmr.msra.gmra.mxu0 %vm1070_vm0, %v1870_v32  ;;  %v1866_v31 = vmul.f32 %v3590_v34, %v4497_v54  ;;  %v4983_v54 = vpack.c.bf16 %v4981_v4, %v4982_v30  ;;  %v4996_v32 = vpack.c.bf16 %v4994_v28, %v4995_v62  ;;  %v4999_v4 = vld [vmem:[#allocation14_spill] sm:$0xff] }
 0x765   :  { %3306 = vmatpush3.bf16.xpose.msra.mxu0 %v4363_v25  ;;  %v1867_v16 = vmul.f32 %v3592_v49, %v4495_v53 }
 0x766   :  { %v1871_v22 = vpack.c.bf16 %v1866_v31, %v1865_v46  ;;  %3307 = vmatprep.subr.bf16.mxu0 %v4371_v26  ;;  %v4997_v46 = vld [vmem:[#allocation38_spill] sm:$0xff] }
 0x767   :  { %v3594_v27 = vpop.eup %3593 }
 0x768   :  { %v1868_v11 = vmul.f32 %v3594_v27, %v4504_v13  ;;  %3301 = vmatprep.mubr.msk.bf16.mxu0 %vm1070_vm0, %v1871_v22  ;;  %v2238_v14 = vpop.xlane.xlu0 %2237 }
 0x76a   :  { %v1872_v3 = vpack.c.bf16 %v1868_v11, %v1867_v16 }
 0x76c   :  { %3302 = vmatmul.mubr.msk.bf16.gmra.mxu0 %vm1070_vm0, %v1872_v3  ;;  %v2244_v13 = vpop.xlane.xlu0 %2243 }
 0x76d   :  { %3308 = vmatpush3.bf16.xpose.msra.mxu0 %v4371_v26  ;;  %3313 = vmatprep.mubr.bf16.mxu0 %v4983_v54  ;;  %v2241_v57 = vpop.xlane.xlu1 %2240 }
 0x76e   :  { %3309 = vmatprep.subr.bf16.mxu0 %v4380_v38  ;;  %3595 = vrcp.f32 %v2241_v57  ;;  %v5004_v57 = vld [vmem:[#allocation20_spill] sm:$0xff] }
 0x76f   :  { %3597 = vrcp.f32 %v2238_v14 }
 0x770   :  { %v2250_v10 = vpop.xlane.xlu0 %2249 }
 0x771   :  { %v2247_v53 = vpop.xlane.xlu1 %2246 }
 0x772   :  { %3599 = vrcp.f32 %v2247_v53  ;;  %v5007_v53 = vld [vmem:[#allocation26_spill] sm:$0xff] }
 0x774   :  { %v2256_v55 = vpop.xlane.xlu0 %2255 }
 0x775   :  { %3310 = vmatpush3.bf16.xpose.msra.mxu0 %v4380_v38  ;;  %v2253_v24 = vpop.xlane.xlu1 %2252 }
 0x776   :  { %3311 = vmatprep.subr.bf16.mxu0 %v4384_v42  ;;  %3601 = vrcp.f32 %v2253_v24 }
 0x777   :  { %3603 = vrcp.f32 %v2244_v13 }
 0x778   :  { %3605 = vrcp.f32 %v2250_v10 }
 0x779   :  { %v2259_v44 = vpop.xlane.xlu1 %2258 }
 0x77a   :  { %3607 = vrcp.f32 %v2259_v44 }
 0x77b   :  { %v3596_v21 = vpop.eup %3595  ;;  %3609 = vrcp.f32 %v2256_v55 }
 0x77c   :  { %v3598_v48 = vpop.eup %3597  ;;  %v2269_v29 = vmul.f32 %v3596_v21, %v4521_v58 }
 0x77d   :  { %3312 = vmatpush3.bf16.xpose.msra.mxu0 %v4384_v42  ;;  %v2268_v20 = vmul.f32 %v3598_v48, %v4515_v61 }
 0x77e   :  { %3337 = vmatprep.subr.bf16.mxu0 %v1002_v63 }
 0x77f   :  { %v3600_v35 = vpop.eup %3599  ;;  %v2276_v6 = vpack.c.bf16 %v2269_v29, %v2268_v20 }
 0x780   :  { %v2271_v49 = vmul.f32 %v3600_v35, %v4529_v0 }
 0x783   :  { %v3602_v23 = vpop.eup %3601 }
 0x784   :  { %3314 = vmatmul.mubr.bf16.vlgmr.msra.gmra.mxu0 %v4988_v15  ;;  %v3604_v34 = vpop.eup %3603  ;;  %v2273_v61 = vmul.f32 %v3602_v23, %v4537_v59 }
 0x785   :  { %3317 = vmatprep.mubr.bf16.mxu0 %v4991_v39  ;;  %3338 = vmatpush3.bf16.msra.mxu0 %v1002_v63  ;;  %v3606_v58 = vpop.eup %3605  ;;  %v2270_v31 = vmul.f32 %v3604_v34, %v4519_v47  ;;  %v5012_v63 = vld [vmem:[#allocation33_spill] sm:$0xff] }
 0x786   :  { %3339 = vmatprep.subr.bf16.mxu0 %v4992_v8  ;;  %v2272_v27 = vmul.f32 %v3606_v58, %v4527_v45  ;;  %v4998_v45 = vld [vmem:[#allocation17_spill] sm:$0xff]  ;;  %v5013_v24 = vpack.c.bf16 %v5011_v18, %v5012_v63 }
 0x787   :  { %v2277_v22 = vpack.c.bf16 %v2271_v49, %v2270_v31  ;;  %v3608_v16 = vpop.eup %3607  ;;  %v5000_v30 = vpack.c.bf16 %v4998_v45, %v4999_v4 }
 0x788   :  { %v2278_v11 = vpack.c.bf16 %v2273_v61, %v2272_v27  ;;  %v3610_v3 = vpop.eup %3609  ;;  %v2275_v0 = vmul.f32 %v3608_v16, %v4543_v19  ;;  %v5002_v19 = vld [vmem:[#allocation52_spill] sm:$0xff] }
 0x789   :  { %3340 = vmatpush3.bf16.msra.mxu0 %v4992_v8  ;;  %v2274_v47 = vmul.f32 %v3610_v3, %v4535_v52  ;;  %v5003_v52 = vld [vmem:[#allocation23_spill] sm:$0xff] }
 0x78a   :  { %3341 = vmatprep.subr.bf16.mxu0 %v4993_v41  ;;  %v5005_v14 = vpack.c.bf16 %v5003_v52, %v5004_v57 }
 0x78b   :  { %v2279_v59 = vpack.c.bf16 %v2275_v0, %v2274_v47 }
 0x78c   :  { %3318 = vmatmul.mubr.bf16.gmra.mxu0 %v4996_v32 }
 0x78d   :  { %3342 = vmatpush3.bf16.msra.mxu0 %v4993_v41  ;;  %3345 = vmatprep.mubr.msk.bf16.mxu0 %vm1070_vm0, %v2276_v6 }
 0x78e   :  { %3343 = vmatprep.subr.bf16.mxu0 %v4997_v46 }
 0x791   :  { %3344 = vmatpush3.bf16.msra.mxu0 %v4997_v46 }
 0x792   :  { %3369 = vmatprep.subr.bf16.mxu0 %v4363_v25 }
 0x794   :  { %3346 = vmatmul.mubr.msk.bf16.vlgmr.msra.gmra.mxu0 %vm1070_vm0, %v2277_v22 }
 0x795   :  { %3349 = vmatprep.mubr.msk.bf16.mxu0 %vm1070_vm0, %v2278_v11  ;;  %3370 = vmatpush3.bf16.xpose.msra.mxu0 %v4363_v25  ;;  %v5001_v25 = vld [vmem:[#allocation50_spill] sm:$0xff] }
 0x796   :  { %3371 = vmatprep.subr.bf16.mxu0 %v4371_v26  ;;  %v1004_v54 = vpack.c.bf16 %v5002_v19, %v5001_v25 }
 0x79c   :  { %3350 = vmatmul.mubr.msk.bf16.gmra.mxu0 %vm1070_vm0, %v2279_v59 }
 0x79d   :  { %3372 = vmatpush3.bf16.xpose.msra.mxu0 %v4371_v26  ;;  %3377 = vmatprep.mubr.bf16.mxu0 %v5000_v30  ;;  %v5006_v26 = vld [vmem:[#allocation30_spill] sm:$0xff] }
 0x79e   :  { %3373 = vmatprep.subr.bf16.mxu0 %v4380_v38  ;;  %v5008_v13 = vpack.c.bf16 %v5006_v26, %v5007_v53 }
 0x7a5   :  { %3374 = vmatpush3.bf16.xpose.msra.mxu0 %v4380_v38  ;;  %v5010_v38 = vld [vmem:[#allocation46_spill] sm:$0xff] }
 0x7a6   :  { %3375 = vmatprep.subr.bf16.mxu0 %v4384_v42 }
 0x7ad   :  { %3376 = vmatpush3.bf16.xpose.msra.mxu0 %v4384_v42  ;;  %v5014_v42 = vld [vmem:[#allocation42_spill] sm:$0xff] }
 0x7ae   :  { %3417 = vmatprep.subr.bf16.mxu0 %v1004_v54 }
 0x7b4   :  { %3378 = vmatmul.mubr.bf16.vlgmr.msra.gmra.mxu0 %v5005_v14 }
 0x7b5   :  { %3381 = vmatprep.mubr.bf16.mxu0 %v5008_v13  ;;  %3418 = vmatpush3.bf16.msra.mxu0 %v1004_v54 }
 0x7b6   :  { %3419 = vmatprep.subr.bf16.mxu0 %v5009_v1 }
 0x7b9   :  { %3420 = vmatpush3.bf16.msra.mxu0 %v5009_v1 }
 0x7ba   :  { %3421 = vmatprep.subr.bf16.mxu0 %v5010_v38 }
 0x7bc   :  { %3382 = vmatmul.mubr.bf16.gmra.mxu0 %v5013_v24 }
 0x7bd   :  { %3422 = vmatpush3.bf16.msra.mxu0 %v5010_v38 }
 0x7be   :  { %3423 = vmatprep.subr.bf16.mxu0 %v5014_v42 }
 0x7c1   :  { %3424 = vmatpush3.bf16.msra.mxu0 %v5014_v42 }
 0x824   :  { %v3299_v10 = vpop.f32.mrf.mxu0 }
 0x825   :  { %v1952_v44 = vadd.f32 %v3299_v10, %v4410_v5  ;;  %v1463_v5 = vadd.f32 %v4406_v60, %v4222_v36 }
 0x826   :  { %v1919_v21 = vpop.f32.mrf.mxu0 }
 0x827   :  { %1960 = vst [vmem:[#allocation7 + $0x10] sm:$0xff] %v1952_v44  ;;  %v1950_v37 = vadd.f32 %v1919_v21, %v4413_v43  ;;  %v1713_v29 = vadd.f32 %v4429_v40, %v1463_v5 }
 0x828   :  { %v3300_v17 = vpop.f32.mrf.mxu0 }
 0x829   :  { %1958 = vst [vmem:[#allocation7] sm:$0xff] %v1950_v37  ;;  %v1953_v15 = vadd.f32 %v3300_v17, %v4416_v9 }
 0x82a   :  { %v1922_v55 = vpop.f32.mrf.mxu0 }
 0x82b   :  { %1961 = vst [vmem:[#allocation7 + $0x18] sm:$0xff] %v1953_v15  ;;  %v1951_v12 = vadd.f32 %v1922_v55, %v4419_v50 }
 0x82c   :  { %v3303_v51 = vpop.f32.mrf.mxu0 }
 0x82d   :  { %1959 = vst [vmem:[#allocation7 + $0x8] sm:$0xff] %v1951_v12  ;;  %v1956_v39 = vadd.f32 %v3303_v51, %v4422_v2 }
 0x82e   :  { %v1935_v48 = vpop.f32.mrf.mxu0 }
 0x82f   :  { %1964 = vst [vmem:[#allocation7 + $0x30] sm:$0xff] %v1956_v39  ;;  %v1954_v8 = vadd.f32 %v1935_v48, %v4425_v33 }
 0x830   :  { %v3304_v43 = vpop.f32.mrf.mxu0 }
 0x831   :  { %1962 = vst [vmem:[#allocation7 + $0x20] sm:$0xff] %v1954_v8  ;;  %v1957_v9 = vadd.f32 %v3304_v43, %v4427_v56 }
 0x832   :  { %v1938_v20 = vpop.f32.mrf.mxu0 }
 0x833   :  { %1965 = vst [vmem:[#allocation7 + $0x38] sm:$0xff] %v1957_v9  ;;  %v1955_v50 = vadd.f32 %v1938_v20, %v1713_v29 }
 0x835   :  { %1963 = vst [vmem:[#allocation7 + $0x28] sm:$0xff] %v1955_v50 }
 0x844   :  { %v4636_v41 = vpop.f32.mrf.mxu0 }
 0x845   :  { %v2037_v33 = vsel %vm1070_vm0, %v4636_v41, -inf }
 0x846   :  { %v2000_v2 = vpop.f32.mrf.mxu0 }
 0x847   :  { %v2031_v35 = vsel %vm1070_vm0, %v2000_v2, -inf }
 0x848   :  { %2032 = vmax.xlane.f32.xlu0 %v2031_v35  ;;  %v4639_v36 = vpop.f32.mrf.mxu0 }
 0x849   :  { %v2040_v23 = vsel %vm1070_vm0, %v4639_v36, -inf }
 0x84a   :  { %v2003_v60 = vpop.f32.mrf.mxu0 }
 0x84b   :  { %v2034_v40 = vsel %vm1070_vm0, %v2003_v60, -inf }
 0x84c   :  { %2038 = vmax.xlane.f32.xlu0 %v2037_v33  ;;  %2035 = vmax.xlane.f32.xlu1 %v2034_v40  ;;  %v4644_v56 = vpop.f32.mrf.mxu0 }
 0x84d   :  { %v2049_v34 = vsel %vm1070_vm0, %v4644_v56, -inf }
 0x84e   :  { %v2016_v6 = vpop.f32.mrf.mxu0 }
 0x84f   :  { %v2043_v28 = vsel %vm1070_vm0, %v2016_v6, -inf }
 0x850   :  { %2041 = vmax.xlane.f32.xlu1 %v2040_v23  ;;  %2044 = vmax.xlane.f32.xlu0 %v2043_v28  ;;  %v4649_v62 = vpop.f32.mrf.mxu0 }
 0x851   :  { %v2052_v46 = vsel %vm1070_vm0, %v4649_v62, -inf }
 0x852   :  { %v4651_v32 = vpop.f32.mrf.mxu0 }
 0x853   :  { %v2046_v58 = vsel %vm1070_vm0, %v4651_v32, -inf }
 0x854   :  { %2050 = vmax.xlane.f32.xlu0 %v2049_v34  ;;  %2047 = vmax.xlane.f32.xlu1 %v2046_v58  ;;  %v4657_v49 = vpop.f32.mrf.mxu0 }
 0x856   :  { %v4661_v61 = vpop.f32.mrf.mxu0 }
 0x858   :  { %2053 = vmax.xlane.f32.xlu1 %v2052_v46  ;;  %v4663_v31 = vpop.f32.mrf.mxu0 }
 0x85a   :  { %v4665_v27 = vpop.f32.mrf.mxu0 }
 0x85c   :  { %v4667_v22 = vpop.f32.mrf.mxu0 }
 0x85e   :  { %v4669_v16 = vpop.f32.mrf.mxu0 }
 0x860   :  { %v4671_v11 = vpop.f32.mrf.mxu0 }
 0x862   :  { %v4673_v3 = vpop.f32.mrf.mxu0 }
 0x874   :  { %v4675_v0 = vpop.f32.mrf.mxu0 }
 0x875   :  { %v2505_v30 = vsel %vm1070_vm0, %v4675_v0, -inf }
 0x876   :  { %v4677_v47 = vpop.f32.mrf.mxu0 }
 0x877   :  { %v2499_v59 = vsel %vm1070_vm0, %v4677_v47, -inf }
 0x878   :  { %2500 = vmax.xlane.f32.xlu0 %v2499_v59  ;;  %v4681_v45 = vpop.f32.mrf.mxu0 }
 0x879   :  { %v2508_v52 = vsel %vm1070_vm0, %v4681_v45, -inf }
 0x87a   :  { %v4683_v4 = vpop.f32.mrf.mxu0 }
 0x87b   :  { %v2502_v25 = vsel %vm1070_vm0, %v4683_v4, -inf }
 0x87c   :  { %2506 = vmax.xlane.f32.xlu0 %v2505_v30  ;;  %2503 = vmax.xlane.f32.xlu1 %v2502_v25  ;;  %v4689_v19 = vpop.f32.mrf.mxu0 }
 0x87d   :  { %v2517_v53 = vsel %vm1070_vm0, %v4689_v19, -inf }
 0x87e   :  { %v4691_v54 = vpop.f32.mrf.mxu0 }
 0x87f   :  { %v2511_v57 = vsel %vm1070_vm0, %v4691_v54, -inf }
 0x880   :  { %2509 = vmax.xlane.f32.xlu1 %v2508_v52  ;;  %2512 = vmax.xlane.f32.xlu0 %v2511_v57  ;;  %v4697_v14 = vpop.f32.mrf.mxu0 }
 0x881   :  { %v2520_v1 = vsel %vm1070_vm0, %v4697_v14, -inf }
 0x882   :  { %v4699_v26 = vpop.f32.mrf.mxu0 }
 0x883   :  { %v2514_v13 = vsel %vm1070_vm0, %v4699_v26, -inf }
 0x884   :  { %2518 = vmax.xlane.f32.xlu0 %v2517_v53  ;;  %2515 = vmax.xlane.f32.xlu1 %v2514_v13 }
 0x888   :  { %2521 = vmax.xlane.f32.xlu1 %v2520_v1 }
 0x8d1   :  { %v2033_v38 = vpop.xlane.xlu0 %2032 }
 0x8d2   :  { %v2055_v18 = vsub.f32 %v2000_v2, %v2033_v38 }
 0x8d4   :  { %v2063_v63 = vmul.f32 1.442695, %v2055_v18 }
 0x8d5   :  { %v2039_v24 = vpop.xlane.xlu0 %2038  ;;  %v2036_v42 = vpop.xlane.xlu1 %2035 }
 0x8d6   :  { %3611 = vpow2.f32 %v2063_v63  ;;  %v2057_v10 = vsub.f32 %v4636_v41, %v2039_v24  ;;  %v2056_v44 = vsub.f32 %v2003_v60, %v2036_v42 }
 0x8d8   :  { %v2067_v21 = vmul.f32 1.442695, %v2057_v10  ;;  %v2065_v37 = vmul.f32 1.442695, %v2056_v44 }
 0x8d9   :  { %v2045_v17 = vpop.xlane.xlu0 %2044  ;;  %v2042_v15 = vpop.xlane.xlu1 %2041 }
 0x8da   :  { %3613 = vpow2.f32 %v2067_v21  ;;  %v2059_v55 = vsub.f32 %v2016_v6, %v2045_v17  ;;  %v2058_v12 = vsub.f32 %v4639_v36, %v2042_v15 }
 0x8db   :  { %3615 = vpow2.f32 %v2065_v37 }
 0x8dc   :  { %v2071_v51 = vmul.f32 1.442695, %v2059_v55  ;;  %v2069_v39 = vmul.f32 1.442695, %v2058_v12 }
 0x8dd   :  { %v2051_v48 = vpop.xlane.xlu0 %2050  ;;  %v2048_v5 = vpop.xlane.xlu1 %2047 }
 0x8de   :  { %3617 = vpow2.f32 %v2071_v51  ;;  %v2061_v8 = vsub.f32 %v4644_v56, %v2051_v48  ;;  %v2060_v43 = vsub.f32 %v4651_v32, %v2048_v5 }
 0x8df   :  { %3619 = vpow2.f32 %v2069_v39 }
 0x8e0   :  { %v2075_v29 = vmul.f32 1.442695, %v2061_v8  ;;  %v2073_v9 = vmul.f32 1.442695, %v2060_v43 }
 0x8e1   :  { %v2054_v20 = vpop.xlane.xlu1 %2053 }
 0x8e2   :  { %3621 = vpow2.f32 %v2075_v29  ;;  %v2062_v50 = vsub.f32 %v4649_v62, %v2054_v20 }
 0x8e3   :  { %v4712_v41 = vpop.eup %3611  ;;  %3623 = vpow2.f32 %v2073_v9 }
 0x8e4   :  { %v2077_v2 = vmul.f32 1.442695, %v2062_v50  ;;  %v2079_v35 = vsel %vm1070_vm0, %v4712_v41, 0.0 }
 0x8e5   :  { %2080 = vadd.xlane.f32.xlu0 %v2079_v35 }
 0x8e6   :  { %3625 = vpow2.f32 %v2077_v2 }
 0x8e7   :  { %v4716_v36 = vpop.eup %3613 }
 0x8e8   :  { %v4718_v60 = vpop.eup %3615  ;;  %v2085_v33 = vsel %vm1070_vm0, %v4716_v36, 0.0 }
 0x8e9   :  { %2086 = vadd.xlane.f32.xlu0 %v2085_v33  ;;  %v2082_v40 = vsel %vm1070_vm0, %v4718_v60, 0.0 }
 0x8ea   :  { %2083 = vadd.xlane.f32.xlu1 %v2082_v40 }
 0x8eb   :  { %v4724_v56 = vpop.eup %3617 }
 0x8ec   :  { %v4726_v6 = vpop.eup %3619  ;;  %v2091_v23 = vsel %vm1070_vm0, %v4724_v56, 0.0 }
 0x8ed   :  { %2092 = vadd.xlane.f32.xlu0 %v2091_v23  ;;  %v2088_v28 = vsel %vm1070_vm0, %v4726_v6, 0.0 }
 0x8ee   :  { %2089 = vadd.xlane.f32.xlu1 %v2088_v28 }
 0x8ef   :  { %v4732_v62 = vpop.eup %3621 }
 0x8f0   :  { %v4734_v32 = vpop.eup %3623  ;;  %v2097_v34 = vsel %vm1070_vm0, %v4732_v62, 0.0 }
 0x8f1   :  { %2098 = vadd.xlane.f32.xlu0 %v2097_v34  ;;  %v2094_v58 = vsel %vm1070_vm0, %v4734_v32, 0.0 }
 0x8f2   :  { %2095 = vadd.xlane.f32.xlu1 %v2094_v58 }
 0x8f3   :  { %v4740_v46 = vpop.eup %3625 }
 0x8f4   :  { %v2100_v59 = vsel %vm1070_vm0, %v4740_v46, 0.0 }
 0x8f6   :  { %2101 = vadd.xlane.f32.xlu1 %v2100_v59 }
 0x901   :  { %v2501_v30 = vpop.xlane.xlu0 %2500 }
 0x902   :  { %v2523_v25 = vsub.f32 %v4677_v47, %v2501_v30 }
 0x904   :  { %v2531_v52 = vmul.f32 1.442695, %v2523_v25 }
 0x905   :  { %v2507_v57 = vpop.xlane.xlu0 %2506  ;;  %v2504_v53 = vpop.xlane.xlu1 %2503 }
 0x906   :  { %3627 = vpow2.f32 %v2531_v52  ;;  %v2525_v13 = vsub.f32 %v4675_v0, %v2507_v57  ;;  %v2524_v1 = vsub.f32 %v4683_v4, %v2504_v53 }
 0x908   :  { %v2535_v38 = vmul.f32 1.442695, %v2525_v13  ;;  %v2533_v18 = vmul.f32 1.442695, %v2524_v1 }
 0x909   :  { %v2510_v63 = vpop.xlane.xlu1 %2509  ;;  %v2513_v24 = vpop.xlane.xlu0 %2512 }
 0x90a   :  { %3629 = vpow2.f32 %v2535_v38  ;;  %v2526_v42 = vsub.f32 %v4681_v45, %v2510_v63  ;;  %v2527_v10 = vsub.f32 %v4691_v54, %v2513_v24 }
 0x90b   :  { %3631 = vpow2.f32 %v2533_v18 }
 0x90c   :  { %v2537_v44 = vmul.f32 1.442695, %v2526_v42  ;;  %v2539_v47 = vmul.f32 1.442695, %v2527_v10 }
 0x90d   :  { %v2519_v21 = vpop.xlane.xlu0 %2518  ;;  %v2516_v37 = vpop.xlane.xlu1 %2515 }
 0x90e   :  { %3633 = vpow2.f32 %v2537_v44  ;;  %v2529_v17 = vsub.f32 %v4689_v19, %v2519_v21  ;;  %v2528_v0 = vsub.f32 %v4699_v26, %v2516_v37 }
 0x90f   :  { %3635 = vpow2.f32 %v2539_v47 }
 0x910   :  { %v2543_v4 = vmul.f32 1.442695, %v2529_v17  ;;  %v2541_v15 = vmul.f32 1.442695, %v2528_v0  ;;  %v5016_v17 = vld [vmem:[#allocation44_spill] sm:$0xff] }
 0x911   :  { %v2522_v55 = vpop.xlane.xlu1 %2521 }
 0x912   :  { %3637 = vpow2.f32 %v2543_v4  ;;  %v2530_v12 = vsub.f32 %v4697_v14, %v2522_v55 }
 0x913   :  { %v4752_v45 = vpop.eup %3627  ;;  %3639 = vpow2.f32 %v2541_v15 }
 0x914   :  { %v2545_v54 = vmul.f32 1.442695, %v2530_v12  ;;  %v2547_v51 = vsel %vm1070_vm0, %v4752_v45, 0.0 }
 0x915   :  { %2548 = vadd.xlane.f32.xlu0 %v2547_v51 }
 0x916   :  { %3641 = vpow2.f32 %v2545_v54 }
 0x917   :  { %v4756_v39 = vpop.eup %3629 }
 0x918   :  { %v4758_v19 = vpop.eup %3631  ;;  %v2553_v26 = vsel %vm1070_vm0, %v4756_v39, 0.0 }
 0x919   :  { %2554 = vadd.xlane.f32.xlu0 %v2553_v26  ;;  %v2550_v14 = vsel %vm1070_vm0, %v4758_v19, 0.0 }
 0x91a   :  { %2551 = vadd.xlane.f32.xlu1 %v2550_v14 }
 0x91b   :  { %v4764_v48 = vpop.eup %3633 }
 0x91c   :  { %v4766_v5 = vpop.eup %3635  ;;  %v2556_v8 = vsel %vm1070_vm0, %v4764_v48, 0.0 }
 0x91d   :  { %v2559_v43 = vsel %vm1070_vm0, %v4766_v5, 0.0 }
 0x91e   :  { %2560 = vadd.xlane.f32.xlu0 %v2559_v43  ;;  %2557 = vadd.xlane.f32.xlu1 %v2556_v8 }
 0x91f   :  { %v4772_v29 = vpop.eup %3637 }
 0x920   :  { %v4774_v9 = vpop.eup %3639  ;;  %v2565_v20 = vsel %vm1070_vm0, %v4772_v29, 0.0 }
 0x921   :  { %v2562_v50 = vsel %vm1070_vm0, %v4774_v9, 0.0 }
 0x922   :  { %2566 = vadd.xlane.f32.xlu0 %v2565_v20  ;;  %2563 = vadd.xlane.f32.xlu1 %v2562_v50 }
 0x923   :  { %v4780_v2 = vpop.eup %3641 }
 0x924   :  { %v2568_v35 = vsel %vm1070_vm0, %v4780_v2, 0.0 }
 0x926   :  { %2569 = vadd.xlane.f32.xlu1 %v2568_v35 }
 0x96e   :  { %v2081_v33 = vpop.xlane.xlu0 %2080 }
 0x96f   :  { %3643 = vrcp.f32 %v2081_v33 }
 0x972   :  { %v2087_v40 = vpop.xlane.xlu0 %2086 }
 0x973   :  { %v2084_v23 = vpop.xlane.xlu1 %2083 }
 0x974   :  { %3645 = vrcp.f32 %v2084_v23 }
 0x975   :  { %3647 = vrcp.f32 %v2087_v40 }
 0x976   :  { %v2093_v28 = vpop.xlane.xlu0 %2092 }
 0x977   :  { %v2090_v34 = vpop.xlane.xlu1 %2089 }
 0x978   :  { %3649 = vrcp.f32 %v2090_v34 }
 0x979   :  { %3651 = vrcp.f32 %v2093_v28 }
 0x97a   :  { %v2099_v58 = vpop.xlane.xlu0 %2098 }
 0x97b   :  { %v2096_v59 = vpop.xlane.xlu1 %2095 }
 0x97c   :  { %3653 = vrcp.f32 %v2096_v59  ;;  %v3644_v30 = vpop.eup %3643 }
 0x97d   :  { %3655 = vrcp.f32 %v2099_v58  ;;  %v2111_v57 = vmul.f32 %v3644_v30, %v4712_v41  ;;  %v3716_v30 = vld [vmem:[#allocation2 + $0x30] sm:$0xff]  }
 0x97f   :  { %v2102_v25 = vpop.xlane.xlu1 %2101 }
 0x980   :  { %3657 = vrcp.f32 %v2102_v25 }
 0x981   :  { %v3646_v52 = vpop.eup %3645 }
 0x982   :  { %v2112_v53 = vmul.f32 %v3646_v52, %v4718_v60  ;;  %v3648_v13 = vpop.eup %3647  ;;  %v5015_v60 = vld [vmem:[#allocation48_spill] sm:$0xff]  ;;  %v5018_v52 = vld [vmem:[#allocation18_spill] sm:$0xff] }
 0x983   :  { %v2113_v18 = vmul.f32 %v3648_v13, %v4716_v36  ;;  %v5021_v13 = vld [vmem:[#allocation24_spill] sm:$0xff] }
 0x984   :  { %v2119_v1 = vpack.c.bf16 %v2112_v53, %v2111_v57  ;;  %v5019_v57 = vld [vmem:[#allocation15_spill] sm:$0xff] }
 0x985   :  { %v3650_v38 = vpop.eup %3649  ;;  %v3718_v53 = vld [vmem:[#allocation2 + $0x20] sm:$0xff]  }
 0x986   :  { %v2114_v63 = vmul.f32 %v3650_v38, %v4726_v6  ;;  %3361 = vmatprep.mubr.msk.bf16.mxu1 %vm1070_vm0, %v2119_v1  ;;  %v3652_v24 = vpop.eup %3651  ;;  %v5025_v38 = vld [vmem:[#allocation28_spill] sm:$0xff] }
 0x987   :  { %v2115_v44 = vmul.f32 %v3652_v24, %v4724_v56  ;;  %v5028_v24 = vld [vmem:[#allocation34_spill] sm:$0xff] }
 0x988   :  { %v2120_v42 = vpack.c.bf16 %v2114_v63, %v2113_v18  ;;  %v5027_v63 = vld [vmem:[#allocation36_spill] sm:$0xff] }
 0x989   :  { %v3654_v10 = vpop.eup %3653 }
 0x98a   :  { %3362 = vmatmul.mubr.msk.bf16.vlgmr.msra.gmra.mxu1 %vm1070_vm0, %v2120_v42  ;;  %v2116_v41 = vmul.f32 %v3654_v10, %v4734_v32  ;;  %v3656_v47 = vpop.eup %3655  ;;  %v3715_v32 = vld [vmem:[#allocation2 + $0x38] sm:$0xff]   ;;  %v5029_v42 = vpack.c.bf16 %v5027_v63, %v5028_v24 }
 0x98b   :  { %3386 = vmatpush3.bf16.msra.mxu1 %v4980_v7  ;;  %v2117_v6 = vmul.f32 %v3656_v47, %v4732_v62  ;;  %v5017_v7 = vld [vmem:[#allocation40_spill] sm:$0xff] }
 0x98c   :  { %3387 = vmatprep.subr.bf16.mxu1 %v5015_v60  ;;  %v2121_v21 = vpack.c.bf16 %v2116_v41, %v2115_v44 }
 0x98d   :  { %v3658_v36 = vpop.eup %3657 }
 0x98e   :  { %3365 = vmatprep.mubr.msk.bf16.mxu1 %vm1070_vm0, %v2121_v21  ;;  %v2118_v37 = vmul.f32 %v3658_v36, %v4740_v46 }
 0x98f   :  { %3388 = vmatpush3.bf16.msra.mxu1 %v5015_v60 }
 0x990   :  { %3389 = vmatprep.subr.bf16.mxu1 %v5016_v17  ;;  %v2122_v56 = vpack.c.bf16 %v2118_v37, %v2117_v6 }
 0x992   :  { %3366 = vmatmul.mubr.msk.bf16.gmra.mxu1 %vm1070_vm0, %v2122_v56 }
 0x993   :  { %3390 = vmatpush3.bf16.msra.mxu1 %v5016_v17 }
 0x994   :  { %3391 = vmatprep.subr.bf16.mxu1 %v5017_v7 }
 0x997   :  { %3392 = vmatpush3.bf16.msra.mxu1 %v5017_v7 }
 0x998   :  { %3401 = vmatprep.subr.bf16.mxu1 %v3715_v32 }
 0x99e   :  { %v2549_v0 = vpop.xlane.xlu0 %2548 }
 0x99f   :  { %3659 = vrcp.f32 %v2549_v0 }
 0x9a2   :  { %v2555_v62 = vpop.xlane.xlu0 %2554 }
 0x9a3   :  { %v2552_v4 = vpop.xlane.xlu1 %2551 }
 0x9a4   :  { %3661 = vrcp.f32 %v2552_v4 }
 0x9a5   :  { %3663 = vrcp.f32 %v2555_v62 }
 0x9a7   :  { %v2561_v46 = vpop.xlane.xlu0 %2560  ;;  %v2558_v15 = vpop.xlane.xlu1 %2557 }
 0x9a8   :  { %3665 = vrcp.f32 %v2558_v15 }
 0x9a9   :  { %3667 = vrcp.f32 %v2561_v46 }
 0x9ab   :  { %v2567_v55 = vpop.xlane.xlu0 %2566  ;;  %v2564_v12 = vpop.xlane.xlu1 %2563 }
 0x9ac   :  { %3669 = vrcp.f32 %v2564_v12  ;;  %v3660_v54 = vpop.eup %3659 }
 0x9ad   :  { %3671 = vrcp.f32 %v2567_v55  ;;  %v2579_v14 = vmul.f32 %v3660_v54, %v4752_v45 }
 0x9af   :  { %v2570_v51 = vpop.xlane.xlu1 %2569 }
 0x9b0   :  { %3673 = vrcp.f32 %v2570_v51 }
 0x9b1   :  { %v3662_v26 = vpop.eup %3661 }
 0x9b2   :  { %v2580_v8 = vmul.f32 %v3662_v26, %v4758_v19  ;;  %v3664_v43 = vpop.eup %3663 }
 0x9b3   :  { %v2581_v35 = vmul.f32 %v3664_v43, %v4756_v39 }
 0x9b4   :  { %v2587_v20 = vpack.c.bf16 %v2580_v8, %v2579_v14 }
 0x9b5   :  { %v3666_v50 = vpop.eup %3665 }
 0x9b6   :  { %3393 = vmatprep.mubr.msk.bf16.mxu1 %vm1070_vm0, %v2587_v20  ;;  %v2582_v33 = vmul.f32 %v3666_v50, %v4764_v48  ;;  %v3668_v40 = vpop.eup %3667 }
 0x9b7   :  { %v2583_v58 = vmul.f32 %v3668_v40, %v4766_v5  ;;  %v5020_v5 = vpack.c.bf16 %v5018_v52, %v5019_v57 }
 0x9b8   :  { %v2588_v23 = vpack.c.bf16 %v2582_v33, %v2581_v35 }
 0x9b9   :  { %v3670_v28 = vpop.eup %3669 }
 0x9ba   :  { %v3672_v34 = vpop.eup %3671  ;;  %3394 = vmatmul.mubr.msk.bf16.vlgmr.msra.gmra.mxu1 %vm1070_vm0, %v2588_v23  ;;  %v2584_v45 = vmul.f32 %v3670_v28, %v4774_v9  ;;  %v3717_v9 = vld [vmem:[#allocation2 + $0x28] sm:$0xff]  }
 0x9bb   :  { %3402 = vmatpush3.bf16.xpose.msra.mxu1 %v3715_v32  ;;  %v2585_v25 = vmul.f32 %v3672_v34, %v4772_v29  ;;  %v5022_v29 = vld [vmem:[#allocation21_spill] sm:$0xff] }
 0x9bc   :  { %v2589_v59 = vpack.c.bf16 %v2584_v45, %v2583_v58  ;;  %3403 = vmatprep.subr.bf16.mxu1 %v3716_v30  ;;  %v5023_v1 = vpack.c.bf16 %v5021_v13, %v5022_v29 }
 0x9bd   :  { %v3674_v19 = vpop.eup %3673 }
 0x9be   :  { %v2586_v39 = vmul.f32 %v3674_v19, %v4780_v2  ;;  %3397 = vmatprep.mubr.msk.bf16.mxu1 %vm1070_vm0, %v2589_v59  ;;  %v5024_v2 = vld [vmem:[#allocation32_spill] sm:$0xff] }
 0x9bf   :  { %v5026_v18 = vpack.c.bf16 %v5024_v2, %v5025_v38 }
 0x9c0   :  { %v2590_v48 = vpack.c.bf16 %v2586_v39, %v2585_v25 }
 0x9c2   :  { %3398 = vmatmul.mubr.msk.bf16.gmra.mxu1 %vm1070_vm0, %v2590_v48 }
 0x9c3   :  { %3404 = vmatpush3.bf16.xpose.msra.mxu1 %v3716_v30  ;;  %3409 = vmatprep.mubr.bf16.mxu1 %v5020_v5 }
 0x9c4   :  { %3405 = vmatprep.subr.bf16.mxu1 %v3717_v9 }
 0x9cb   :  { %3406 = vmatpush3.bf16.xpose.msra.mxu1 %v3717_v9 }
 0x9cc   :  { %3407 = vmatprep.subr.bf16.mxu1 %v3718_v53 }
 0x9d3   :  { %3408 = vmatpush3.bf16.xpose.msra.mxu1 %v3718_v53 }
 0x9da   :  { %3410 = vmatmul.mubr.bf16.vlgmr.msra.gmra.mxu1 %v5023_v1 }
 0x9db   :  { %3413 = vmatprep.mubr.bf16.mxu1 %v5026_v18 }
 0x9e2   :  { %3414 = vmatmul.mubr.bf16.gmra.mxu1 %v5029_v42 }
 0xa4a   :  { %v3363_v10 = vpop.f32.mrf.mxu1 }
 0xa4b   :  { %v2412_v37 = vadd.f32 %v3363_v10, %v4657_v49 }
 0xa4c   :  { %v2403_v44 = vpop.f32.mrf.mxu1 }
 0xa4d   :  { %v2404_v56 = vadd.f32 %v2403_v44, %v4661_v61 }
 0xa4e   :  { %v3364_v41 = vpop.f32.mrf.mxu1 }
 0xa4f   :  { %v2415_v0 = vadd.f32 %v3364_v41, %v4663_v31 }
 0xa50   :  { %v2406_v47 = vpop.f32.mrf.mxu1 }
 0xa51   :  { %v2407_v46 = vadd.f32 %v2406_v47, %v4665_v27 }
 0xa52   :  { %v3367_v60 = vpop.f32.mrf.mxu1 }
 0xa53   :  { %v2428_v12 = vadd.f32 %v3367_v60, %v4667_v22 }
 0xa54   :  { %v2419_v21 = vpop.f32.mrf.mxu1 }
 0xa55   :  { %v2420_v61 = vadd.f32 %v2419_v21, %v4669_v16 }
 0xa56   :  { %v3368_v36 = vpop.f32.mrf.mxu1 }
 0xa57   :  { %v2431_v31 = vadd.f32 %v3368_v36, %v4671_v11 }
 0xa58   :  { %v2422_v6 = vpop.f32.mrf.mxu1 }
 0xa59   :  { %v2423_v27 = vadd.f32 %v2422_v6, %v4673_v3 }
 0xa7a   :  { %v3395_v17 = vpop.f32.mrf.mxu1 }
 0xa7b   :  { %v4829_v7 = vadd.f32 %v3395_v17, %v2412_v37 }
 0xa7c   :  { %v2637_v32 = vpop.f32.mrf.mxu1 }
 0xa7d   :  { %v4832_v62 = vadd.f32 %v2637_v32, %v2404_v56 }
 0xa7e   :  { %v3396_v4 = vpop.f32.mrf.mxu1 }
 0xa7f   :  { %v4835_v15 = vadd.f32 %v3396_v4, %v2415_v0 }
 0xa80   :  { %v2640_v55 = vpop.f32.mrf.mxu1 }
 0xa81   :  { %v4838_v54 = vadd.f32 %v2640_v55, %v2407_v46 }
 0xa82   :  { %v3399_v49 = vpop.f32.mrf.mxu1 }
 0xa83   :  { %v4841_v51 = vadd.f32 %v3399_v49, %v2428_v12 }
 0xa84   :  { %v2653_v26 = vpop.f32.mrf.mxu1 }
 0xa85   :  { %v4844_v14 = vadd.f32 %v2653_v26, %v2420_v61 }
 0xa86   :  { %v3400_v8 = vpop.f32.mrf.mxu1 }
 0xa87   :  { %v4847_v43 = vadd.f32 %v3400_v8, %v2431_v31 }
 0xa88   :  { %v2656_v20 = vpop.f32.mrf.mxu1 }
 0xa89   :  { %v4849_v50 = vadd.f32 %v2656_v20, %v2423_v27 }
 0xa9a   :  { %v3411_v22 = vpop.f32.mrf.mxu1 }
 0xa9b   :  { %v2747_v23 = vsel %vm1070_vm0, %v3411_v22, -inf }
 0xa9c   :  { %v2710_v35 = vpop.f32.mrf.mxu1 }
 0xa9d   :  { %v2741_v33 = vsel %vm1070_vm0, %v2710_v35, -inf }
 0xa9e   :  { %2742 = vmax.xlane.f32.xlu0 %v2741_v33  ;;  %v3412_v16 = vpop.f32.mrf.mxu1 }
 0xa9f   :  { %v2750_v34 = vsel %vm1070_vm0, %v3412_v16, -inf }
 0xaa0   :  { %v2713_v40 = vpop.f32.mrf.mxu1 }
 0xaa1   :  { %v2744_v11 = vsel %vm1070_vm0, %v2713_v40, -inf }
 0xaa2   :  { %2748 = vmax.xlane.f32.xlu0 %v2747_v23  ;;  %2745 = vmax.xlane.f32.xlu1 %v2744_v11  ;;  %v3415_v28 = vpop.f32.mrf.mxu1 }
 0xaa3   :  { %v2759_v30 = vsel %vm1070_vm0, %v3415_v28, -inf }
 0xaa4   :  { %v2726_v3 = vpop.f32.mrf.mxu1 }
 0xaa5   :  { %v2753_v58 = vsel %vm1070_vm0, %v2726_v3, -inf }
 0xaa6   :  { %2751 = vmax.xlane.f32.xlu1 %v2750_v34  ;;  %2754 = vmax.xlane.f32.xlu0 %v2753_v58  ;;  %v3416_v45 = vpop.f32.mrf.mxu1 }
 0xaa7   :  { %v2762_v25 = vsel %vm1070_vm0, %v3416_v45, -inf }
 0xaa8   :  { %v2729_v19 = vpop.f32.mrf.mxu1 }
 0xaa9   :  { %v2756_v59 = vsel %vm1070_vm0, %v2729_v19, -inf }
 0xaaa   :  { %2760 = vmax.xlane.f32.xlu0 %v2759_v30  ;;  %2757 = vmax.xlane.f32.xlu1 %v2756_v59 }
 0xaae   :  { %2763 = vmax.xlane.f32.xlu1 %v2762_v25 }
 0xb27   :  { %v2743_v39 = vpop.xlane.xlu0 %2742 }
 0xb28   :  { %v2765_v48 = vsub.f32 %v2710_v35, %v2743_v39 }
 0xb2a   :  { %v2773_v52 = vmul.f32 1.442695, %v2765_v48 }
 0xb2b   :  { %v2749_v57 = vpop.xlane.xlu0 %2748  ;;  %v2746_v5 = vpop.xlane.xlu1 %2745 }
 0xb2c   :  { %3675 = vpow2.f32 %v2773_v52  ;;  %v2767_v9 = vsub.f32 %v3411_v22, %v2749_v57  ;;  %v2766_v53 = vsub.f32 %v2713_v40, %v2746_v5 }
 0xb2e   :  { %v2777_v13 = vmul.f32 1.442695, %v2767_v9  ;;  %v2775_v29 = vmul.f32 1.442695, %v2766_v53 }
 0xb2f   :  { %v2752_v1 = vpop.xlane.xlu1 %2751  ;;  %v2755_v2 = vpop.xlane.xlu0 %2754 }
 0xb30   :  { %3677 = vpow2.f32 %v2777_v13  ;;  %v2768_v38 = vsub.f32 %v3412_v16, %v2752_v1  ;;  %v2769_v18 = vsub.f32 %v2726_v3, %v2755_v2 }
 0xb31   :  { %3679 = vpow2.f32 %v2775_v29 }
 0xb32   :  { %v2779_v63 = vmul.f32 1.442695, %v2768_v38  ;;  %v2781_v24 = vmul.f32 1.442695, %v2769_v18 }
 0xb33   :  { %v2761_v42 = vpop.xlane.xlu0 %2760  ;;  %v2758_v10 = vpop.xlane.xlu1 %2757 }
 0xb34   :  { %3681 = vpow2.f32 %v2779_v63  ;;  %v2771_v44 = vsub.f32 %v3415_v28, %v2761_v42  ;;  %v2770_v41 = vsub.f32 %v2729_v19, %v2758_v10 }
 0xb35   :  { %3683 = vpow2.f32 %v2781_v24 }
 0xb36   :  { %v2785_v47 = vmul.f32 1.442695, %v2771_v44  ;;  %v2783_v60 = vmul.f32 1.442695, %v2770_v41 }
 0xb37   :  { %v2764_v21 = vpop.xlane.xlu1 %2763 }
 0xb38   :  { %3685 = vpow2.f32 %v2785_v47  ;;  %v2772_v36 = vsub.f32 %v3416_v45, %v2764_v21 }
 0xb39   :  { %v3676_v6 = vpop.eup %3675  ;;  %3687 = vpow2.f32 %v2783_v60 }
 0xb3a   :  { %v2787_v37 = vmul.f32 1.442695, %v2772_v36  ;;  %v2789_v17 = vsel %vm1070_vm0, %v3676_v6, 0.0 }
 0xb3b   :  { %2790 = vadd.xlane.f32.xlu0 %v2789_v17 }
 0xb3c   :  { %3689 = vpow2.f32 %v2787_v37 }
 0xb3d   :  { %v3678_v56 = vpop.eup %3677 }
 0xb3e   :  { %v3680_v32 = vpop.eup %3679  ;;  %v2795_v0 = vsel %vm1070_vm0, %v3678_v56, 0.0 }
 0xb3f   :  { %2796 = vadd.xlane.f32.xlu0 %v2795_v0  ;;  %v2792_v4 = vsel %vm1070_vm0, %v3680_v32, 0.0 }
 0xb40   :  { %2793 = vadd.xlane.f32.xlu1 %v2792_v4 }
 0xb41   :  { %v3682_v46 = vpop.eup %3681 }
 0xb42   :  { %v3684_v55 = vpop.eup %3683  ;;  %v2798_v12 = vsel %vm1070_vm0, %v3682_v46, 0.0 }
 0xb43   :  { %v2801_v49 = vsel %vm1070_vm0, %v3684_v55, 0.0 }
 0xb44   :  { %2802 = vadd.xlane.f32.xlu0 %v2801_v49  ;;  %2799 = vadd.xlane.f32.xlu1 %v2798_v12 }
 0xb45   :  { %v3686_v61 = vpop.eup %3685 }
 0xb46   :  { %v3688_v26 = vpop.eup %3687  ;;  %v2807_v31 = vsel %vm1070_vm0, %v3686_v61, 0.0 }
 0xb47   :  { %v2804_v8 = vsel %vm1070_vm0, %v3688_v26, 0.0 }
 0xb48   :  { %2808 = vadd.xlane.f32.xlu0 %v2807_v31  ;;  %2805 = vadd.xlane.f32.xlu1 %v2804_v8 }
 0xb49   :  { %v3690_v27 = vpop.eup %3689 }
 0xb4a   :  { %v2810_v20 = vsel %vm1070_vm0, %v3690_v27, 0.0 }
 0xb4c   :  { %2811 = vadd.xlane.f32.xlu1 %v2810_v20 }
 0xbc4   :  { %v2791_v22 = vpop.xlane.xlu0 %2790 }
 0xbc5   :  { %3691 = vrcp.f32 %v2791_v22 }
 0xbc8   :  { %v2797_v35 = vpop.xlane.xlu0 %2796 }
 0xbc9   :  { %v2794_v33 = vpop.xlane.xlu1 %2793 }
 0xbca   :  { %3693 = vrcp.f32 %v2794_v33 }
 0xbcb   :  { %3695 = vrcp.f32 %v2797_v35 }
 0xbcd   :  { %v2803_v16 = vpop.xlane.xlu0 %2802  ;;  %v2800_v40 = vpop.xlane.xlu1 %2799 }
 0xbce   :  { %3697 = vrcp.f32 %v2800_v40 }
 0xbcf   :  { %3699 = vrcp.f32 %v2803_v16 }
 0xbd1   :  { %v2809_v23 = vpop.xlane.xlu0 %2808  ;;  %v2806_v11 = vpop.xlane.xlu1 %2805 }
 0xbd2   :  { %3701 = vrcp.f32 %v2806_v11  ;;  %v3692_v28 = vpop.eup %3691 }
 0xbd3   :  { %3703 = vrcp.f32 %v2809_v23  ;;  %v2821_v58 = vmul.f32 %v3692_v28, %v3676_v6 }
 0xbd5   :  { %v2812_v3 = vpop.xlane.xlu1 %2811 }
 0xbd6   :  { %3705 = vrcp.f32 %v2812_v3 }
 0xbd7   :  { %v3694_v34 = vpop.eup %3693 }
 0xbd8   :  { %v2822_v45 = vmul.f32 %v3694_v34, %v3680_v32  ;;  %v3696_v19 = vpop.eup %3695 }
 0xbd9   :  { %v2823_v25 = vmul.f32 %v3696_v19, %v3678_v56 }
 0xbda   :  { %v2829_v59 = vpack.c.bf16 %v2822_v45, %v2821_v58 }
 0xbdb   :  { %v3698_v30 = vpop.eup %3697 }
 0xbdc   :  { %3425 = vmatprep.mubr.msk.bf16.mxu0 %vm1070_vm0, %v2829_v59  ;;  %v2824_v39 = vmul.f32 %v3698_v30, %v3682_v46  ;;  %v3700_v48 = vpop.eup %3699 }
 0xbdd   :  { %v2825_v9 = vmul.f32 %v3700_v48, %v3684_v55 }
 0xbde   :  { %v2830_v52 = vpack.c.bf16 %v2824_v39, %v2823_v25 }
 0xbdf   :  { %v3702_v57 = vpop.eup %3701 }
 0xbe0   :  { %v3704_v5 = vpop.eup %3703  ;;  %3426 = vmatmul.mubr.msk.bf16.vlgmr.msra.gmra.mxu0 %vm1070_vm0, %v2830_v52  ;;  %v2826_v53 = vmul.f32 %v3702_v57, %v3688_v26 }
 0xbe1   :  { %v2827_v1 = vmul.f32 %v3704_v5, %v3686_v61 }
 0xbe2   :  { %v2831_v29 = vpack.c.bf16 %v2826_v53, %v2825_v9 }
 0xbe3   :  { %v3706_v13 = vpop.eup %3705 }
 0xbe4   :  { %v2828_v2 = vmul.f32 %v3706_v13, %v3690_v27  ;;  %3429 = vmatprep.mubr.msk.bf16.mxu0 %vm1070_vm0, %v2831_v29 }
 0xbe6   :  { %v2832_v38 = vpack.c.bf16 %v2828_v2, %v2827_v1 }
 0xbe8   :  { %3430 = vmatmul.mubr.msk.bf16.gmra.mxu0 %vm1070_vm0, %v2832_v38 }
 0xca0   :  { %v3427_v18 = vpop.f32.mrf.mxu0 }
 0xca1   :  { %v2912_v63 = vadd.f32 %v3427_v18, %v4829_v7 }
 0xca2   :  { %v2879_v24 = vpop.f32.mrf.mxu0 }
 0xca3   :  { %2921 = vst [vmem:[#allocation7 + $0x50] sm:$0xff] %v2912_v63  ;;  %v2910_v42 = vadd.f32 %v2879_v24, %v4832_v62 }
 0xca4   :  { %v3428_v10 = vpop.f32.mrf.mxu0 }
 0xca5   :  { %2919 = vst [vmem:[#allocation7 + $0x40] sm:$0xff] %v2910_v42  ;;  %v2913_v44 = vadd.f32 %v3428_v10, %v4835_v15 }
 0xca6   :  { %v2882_v41 = vpop.f32.mrf.mxu0 }
 0xca7   :  { %2922 = vst [vmem:[#allocation7 + $0x58] sm:$0xff] %v2913_v44  ;;  %v2911_v47 = vadd.f32 %v2882_v41, %v4838_v54 }
 0xca8   :  { %v3431_v60 = vpop.f32.mrf.mxu0 }
 0xca9   :  { %2920 = vst [vmem:[#allocation7 + $0x48] sm:$0xff] %v2911_v47  ;;  %v2916_v21 = vadd.f32 %v3431_v60, %v4841_v51 }
 0xcaa   :  { %v2895_v36 = vpop.f32.mrf.mxu0 }
 0xcab   :  { %2925 = vst [vmem:[#allocation7 + $0x70] sm:$0xff] %v2916_v21  ;;  %v2914_v7 = vadd.f32 %v2895_v36, %v4844_v14 }
 0xcac   :  { %v3432_v6 = vpop.f32.mrf.mxu0 }
 0xcad   :  { %2923 = vst [vmem:[#allocation7 + $0x60] sm:$0xff] %v2914_v7  ;;  %v2917_v62 = vadd.f32 %v3432_v6, %v4847_v43 }
 0xcae   :  { %v2898_v37 = vpop.f32.mrf.mxu0 }
 0xcaf   :  { %2926 = vst [vmem:[#allocation7 + $0x78] sm:$0xff] %v2917_v62  ;;  %v2915_v15 = vadd.f32 %v2898_v37, %v4849_v50 }
 0xcb1   :  { %2924 = vst [vmem:[#allocation7 + $0x68] sm:$0xff] %v2915_v15 }
 0xcb2   :  { %3770 = shalt.err (!%p3767_p0)
}
 0xcb3   :  { %s3793_s24 = smov 128   ;;  %s3794_s25 = smov 8  }
 0xcb4   :  { %2938 = dma.vmem_to_hbm [thread:$0]  %s2933_s1, 2048, %s4884_s2, [#allocation4], %s3793_s24, %s3793_s24, %s3794_s25  }
 0xcb5   :  { %3783 = dma.done.wait [#allocation4], 2048  }
 0xcb6   :  { %3784 = vsyncadd [#allocation4], 4294965248 }
 0xcb7   :  { %2942 = vsyncpa [#allocation3], 1 }
 0xcb8   :  { %2943 = vsyncpa [#allocation6], 1 }
 0xcb9   :  { %2944 = vsyncpa [#allocation4], 1 }

</bundles_post_ra>
